<compile_context>
chip_gen: v7x
topology: tpu7x:2x2x1
jax: 0.10.0
libtpu: 0.0.40
codegen_flags: <defaults>
</compile_context>

<pallas_src>
import jax
import jax.numpy as jnp
from jax.experimental import pallas as pl
from jax.experimental.pallas import tpu as pltpu


def _round_up(x, m):
    return (x + m - 1) // m * m


_TM = 256                        # row tile (multiple of 8); fits v7x 64 MiB VMEM in bf16
_VMEM_LIMIT = 32 * 1024 * 1024   # raise v5e's 16 MiB scoped default


# ----------------------------- kernels -------------------------------------


def conv_bn_relu_pool_kernel(p_ref, w_ref, shift_ref, o_ref):
    """Fused Conv2d(3x3,pad=1) + BatchNorm(eval) + ReLU + MaxPool(2,2), one row tile.

    p_ref     : (4, TM, K) bf16  im2col patches, leading axis = 2x2 pool position
    w_ref     : (K, Cout)  bf16  conv weights with the BN scale folded in
    shift_ref : (1, Cout)  f32   folded BN shift (includes conv bias)
    o_ref     : (TM, Cout) f32   pooled activation tile
    """
    tm = o_ref.shape[0]
    k = w_ref.shape[0]
    cout = o_ref.shape[1]
    # One stacked LHS stream through the resident weights (better MXU fill than
    # 4 small matmuls); f32 accumulation on the MXU.
    lhs = p_ref[...].reshape(4 * tm, k)
    y = jnp.dot(lhs, w_ref[...], preferred_element_type=jnp.float32)   # (4*TM, Cout)
    # 2x2 max pool == elementwise max over the 4 pool positions (VPU).
    y = jnp.max(y.reshape(4, tm, cout), axis=0)
    # BN scale folded into w; max/ReLU commute with the per-channel +shift.
    o_ref[...] = jnp.maximum(y + shift_ref[...], 0.0)


def head_kernel(x_ref, w1_ref, b1_ref, w2_ref, b2_ref, o_ref):
    """AdaptiveAvgPool2d((1,1)) + Flatten + Linear + ReLU + Linear for a batch tile.

    x_ref : (TN, H*W, 256) f32.  Dropout layers are identity at inference time.
    """
    pooled = jnp.mean(x_ref[...], axis=1)                               # (TN, 256)
    h = jnp.dot(pooled, w1_ref[...], preferred_element_type=jnp.float32) + b1_ref[...]
    h = jnp.maximum(h, 0.0)
    o_ref[...] = jnp.dot(h, w2_ref[...], preferred_element_type=jnp.float32) + b2_ref[...]


# --------------------------- host-side glue ---------------------------------


def _conv_stage(x_nhwc, w_mat, shift):
    """One features stage.  x_nhwc: (N, H, W, Cin) f32 -> (N, H//2, W//2, Cout) f32."""
    N, H, W, Cin = x_nhwc.shape
    K, Cout = w_mat.shape
    Ho, Wo = H // 2, W // 2          # PyTorch MaxPool2d(2,2) floors odd dims
    M = N * Ho * Wo

    # im2col for the 3x3 conv with padding=1 (host data movement only).
    xp = jnp.pad(x_nhwc, ((0, 0), (1, 1), (1, 1), (0, 0)))
    cols = [xp[:, dy:dy + H, dx:dx + W, :] for dy in range(3) for dx in range(3)]
    patches = jnp.stack(cols, axis=3).reshape(N, H, W, 9 * Cin)
    # Regroup into ONE pos-major bf16 array: (4, M, 9*Cin).
    p = patches[:, :2 * Ho, :2 * Wo, :].reshape(N, Ho, 2, Wo, 2, 9 * Cin)
    p4 = jnp.transpose(p, (2, 4, 0, 1, 3, 5)).reshape(4, M, 9 * Cin)
    p4 = p4.astype(jnp.bfloat16)

    # Row tiling: multiples of 8, padded so the grid divides evenly.
    tm = min(_TM, _round_up(M, 8))
    m_pad = _round_up(M, tm)
    if m_pad != M:
        p4 = jnp.pad(p4, ((0, 0), (0, m_pad - M), (0, 0)))

    # NOTE: stage 1 has Cout=64 (<128 lanes) -> masked output stores; accepted,
    # that stage has negligible MXU work and tiny K.
    out = pl.pallas_call(
        conv_bn_relu_pool_kernel,
        out_shape=jax.ShapeDtypeStruct((m_pad, Cout), jnp.float32),
        grid_spec=pltpu.PrefetchScalarGridSpec(
            num_scalar_prefetch=0,
            grid=(m_pad // tm,),
            in_specs=[
                pl.BlockSpec((4, tm, K), lambda i: (0, i, 0)),
                pl.BlockSpec((K, Cout), lambda i: (0, 0)),
                pl.BlockSpec((1, Cout), lambda i: (0, 0)),
            ],
            out_specs=pl.BlockSpec((tm, Cout), lambda i: (i, 0)),
        ),
        compiler_params=pltpu.CompilerParams(
            dimension_semantics=("parallel",),
            vmem_limit_bytes=_VMEM_LIMIT,
        ),
    )(p4, w_mat, shift)
    return out[:M].reshape(N, Ho, Wo, Cout)


def _head(feats, w1, b1, w2, b2):
    """feats: (N, H*W, 256) f32 -> logits (N, num_classes) f32."""
    N, HW, C = feats.shape
    H1 = w1.shape[1]
    num_classes = w2.shape[1]
    tn = 8
    n_pad = _round_up(N, tn)
    if n_pad != N:
        feats = jnp.pad(feats, ((0, n_pad - N), (0, 0), (0, 0)))

    out = pl.pallas_call(
        head_kernel,
        out_shape=jax.ShapeDtypeStruct((n_pad, num_classes), jnp.float32),
        grid_spec=pltpu.PrefetchScalarGridSpec(
            num_scalar_prefetch=0,
            grid=(n_pad // tn,),
            in_specs=[
                pl.BlockSpec((tn, HW, C), lambda i: (i, 0, 0)),
                pl.BlockSpec((C, H1), lambda i: (0, 0)),
                pl.BlockSpec((1, H1), lambda i: (0, 0)),
                pl.BlockSpec((H1, num_classes), lambda i: (0, 0)),
                pl.BlockSpec((1, num_classes), lambda i: (0, 0)),
            ],
            out_specs=pl.BlockSpec((tn, num_classes), lambda i: (i, 0)),
        ),
        compiler_params=pltpu.CompilerParams(
            dimension_semantics=("parallel",),
            vmem_limit_bytes=_VMEM_LIMIT,
        ),
    )(feats, w1, b1, w2, b2)
    return out[:N]


@jax.jit
def forward(x_nchw, params):
    x = jnp.transpose(x_nchw, (0, 2, 3, 1))             # NCHW -> NHWC
    for sp in params["stages"]:
        x = _conv_stage(x, sp["w"], sp["shift"])
    N, H, W, C = x.shape
    feats = x.reshape(N, H * W, C)
    return _head(feats, params["w1"], params["b1"], params["w2"], params["b2"])


# ------------------------- deterministic params ------------------------------


def _make_stage_params(key, cin, cout):
    kw, kb, kg, kbt, km, kv = jax.random.split(key, 6)
    w = jax.random.normal(kw, (3, 3, cin, cout), jnp.float32) / jnp.sqrt(9.0 * cin)
    b = 0.01 * jax.random.normal(kb, (cout,), jnp.float32)
    gamma = 1.0 + 0.1 * jax.random.normal(kg, (cout,), jnp.float32)
    beta = 0.1 * jax.random.normal(kbt, (cout,), jnp.float32)
    r_mean = 0.1 * jax.random.normal(km, (cout,), jnp.float32)
    r_var = 1.0 + 0.1 * jnp.abs(jax.random.normal(kv, (cout,), jnp.float32))
    eps = 1e-5
    scale = gamma / jnp.sqrt(r_var + eps)
    # Fold the BN scale into the conv weights (one-time constant fold on a tiny
    # weight matrix) and keep a per-channel shift.  Weights cast to bf16 for MXU.
    w_folded = (w * scale).reshape(9 * cin, cout).astype(jnp.bfloat16)
    shift = (beta + scale * (b - r_mean)).reshape(1, cout).astype(jnp.float32)
    return dict(w=w_folded, shift=shift)


def init_params(key, num_classes=38):
    ks = jax.random.split(key, 7)
    stage_dims = [(3, 64), (64, 128), (128, 256)]
    stages = [_make_stage_params(ks[i], cin, cout)
              for i, (cin, cout) in enumerate(stage_dims)]
    w1 = jax.random.normal(ks[3], (256, 512), jnp.float32) / jnp.sqrt(256.0)
    b1 = (0.01 * jax.random.normal(ks[4], (512,), jnp.float32)).reshape(1, 512)
    w2 = jax.random.normal(ks[5], (512, num_classes), jnp.float32) / jnp.sqrt(512.0)
    b2 = (0.01 * jax.random.normal(ks[6], (num_classes,), jnp.float32)).reshape(1, num_classes)
    return dict(stages=stages, w1=w1, b1=b1, w2=w2, b2=b2)


if __name__ == "__main__":
    key = jax.random.PRNGKey(0)
    kx, kp = jax.random.split(key)
    # Small input consistent with the module: NCHW, 3 channels, 16x16 spatial.
    x = jax.random.normal(kx, (2, 3, 16, 16), jnp.float32)
    params = init_params(kp, num_classes=38)
    out = jax.block_until_ready(forward(x, params))
    assert out.shape == (2, 38) and out.dtype == jnp.float32
    print("KERNEL_OK")
</pallas_src>

<mosaic_0001>
module attributes {stable_mosaic.version = 11 : i64} {
  func.func @conv_bn_relu_pool_kernel(%arg0: i32, %arg1: memref<4x128x27xbf16, #tpu.memory_space<vmem>>, %arg2: memref<27x64xbf16, #tpu.memory_space<vmem>>, %arg3: memref<1x64xf32, #tpu.memory_space<vmem>>, %arg4: memref<128x64xf32, #tpu.memory_space<vmem>>) attributes {dimension_semantics = [#tpu.dimension_semantics<parallel>], iteration_bounds = array<i64: 1>, scalar_prefetch = 0 : i64, scratch_operands = 0 : i64, tpu.core_type = #tpu.core_type<tc>, window_params = [{transform_indices = @transform_0, window_bounds = array<i64: 4, 128, 27>}, {pipeline_mode = #tpu.pipeline_mode<synchronous>, transform_indices = @transform_1, window_bounds = array<i64: 27, 64>}, {pipeline_mode = #tpu.pipeline_mode<synchronous>, transform_indices = @transform_2, window_bounds = array<i64: 1, 64>}, {transform_indices = @transform_3, window_bounds = array<i64: 128, 64>}]} {
    %c0 = arith.constant 0 : index
    %c0_0 = arith.constant 0 : index
    %c0_1 = arith.constant 0 : index
    %0 = vector.load %arg1[%c0, %c0_0, %c0_1] : memref<4x128x27xbf16, #tpu.memory_space<vmem>>, vector<4x128x27xbf16>
    %1 = vector.shape_cast %0 : vector<4x128x27xbf16> to vector<512x27xbf16>
    %c0_2 = arith.constant 0 : index
    %c0_3 = arith.constant 0 : index
    %2 = vector.load %arg2[%c0_2, %c0_3] : memref<27x64xbf16, #tpu.memory_space<vmem>>, vector<27x64xbf16>
    %cst = arith.constant dense<0.000000e+00> : vector<512x64xf32>
    %3 = tpu.matmul %1, %2, %cst {dimension_numbers = #tpu.dot_dimension_numbers<[1], [0], [0], [1], [0, 0, 1, 1], [], []>} : vector<512x27xbf16>, vector<27x64xbf16>, vector<512x64xf32> -> vector<512x64xf32>
    %4 = vector.shape_cast %3 : vector<512x64xf32> to vector<4x128x64xf32>
    %cst_4 = arith.constant dense<0xFF800000> : vector<128x64xf32>
    %5 = vector.multi_reduction <maximumf>, %4, %cst_4 [0] : vector<4x128x64xf32> to vector<128x64xf32>
    %c0_5 = arith.constant 0 : index
    %c0_6 = arith.constant 0 : index
    %6 = vector.load %arg3[%c0_5, %c0_6] : memref<1x64xf32, #tpu.memory_space<vmem>>, vector<1x64xf32>
    %7 = vector.broadcast %6 : vector<1x64xf32> to vector<128x64xf32>
    %8 = arith.addf %5, %7 : vector<128x64xf32>
    %cst_7 = arith.constant 0.000000e+00 : f32
    %9 = vector.broadcast %cst_7 : f32 to vector<128x64xf32>
    %10 = arith.maximumf %8, %9 : vector<128x64xf32>
    %c0_8 = arith.constant 0 : index
    %c0_9 = arith.constant 0 : index
    %11 = vector.load %arg4[%c0_8, %c0_9] : memref<128x64xf32, #tpu.memory_space<vmem>>, vector<128x64xf32>
    tpu.vector_store %arg4[%c0_8, %c0_9], %10 {strides = array<i32>} : memref<128x64xf32, #tpu.memory_space<vmem>>, vector<128x64xf32>,
    return
  }
  func.func @transform_0(%arg0: i32) -> (i32, i32, i32) {
    %c0_i32 = arith.constant 0 : i32
    %c0_i32_0 = arith.constant 0 : i32
    %c0_i32_1 = arith.constant 0 : i32
    return %c0_i32, %arg0, %c0_i32_0 : i32, i32, i32
  }
  func.func @transform_1(%arg0: i32) -> (i32, i32) {
    %c0_i32 = arith.constant 0 : i32
    %c0_i32_0 = arith.constant 0 : i32
    %c0_i32_1 = arith.constant 0 : i32
    return %c0_i32, %c0_i32_0 : i32, i32
  }
  func.func @transform_2(%arg0: i32) -> (i32, i32) {
    %c0_i32 = arith.constant 0 : i32
    %c0_i32_0 = arith.constant 0 : i32
    %c0_i32_1 = arith.constant 0 : i32
    return %c0_i32, %c0_i32_0 : i32, i32
  }
  func.func @transform_3(%arg0: i32) -> (i32, i32) {
    %c0_i32 = arith.constant 0 : i32
    %c0_i32_0 = arith.constant 0 : i32
    return %arg0, %c0_i32 : i32, i32
  }
}

module attributes {stable_mosaic.version = 11 : i64} {
  func.func @conv_bn_relu_pool_kernel(%arg0: i32, %arg1: memref<4x32x576xbf16, #tpu.memory_space<vmem>>, %arg2: memref<576x128xbf16, #tpu.memory_space<vmem>>, %arg3: memref<1x128xf32, #tpu.memory_space<vmem>>, %arg4: memref<32x128xf32, #tpu.memory_space<vmem>>) attributes {dimension_semantics = [#tpu.dimension_semantics<parallel>], iteration_bounds = array<i64: 1>, scalar_prefetch = 0 : i64, scratch_operands = 0 : i64, tpu.core_type = #tpu.core_type<tc>, window_params = [{transform_indices = @transform_0, window_bounds = array<i64: 4, 32, 576>}, {pipeline_mode = #tpu.pipeline_mode<synchronous>, transform_indices = @transform_1, window_bounds = array<i64: 576, 128>}, {pipeline_mode = #tpu.pipeline_mode<synchronous>, transform_indices = @transform_2, window_bounds = array<i64: 1, 128>}, {transform_indices = @transform_3, window_bounds = array<i64: 32, 128>}]} {
    %c0 = arith.constant 0 : index
    %c0_0 = arith.constant 0 : index
    %c0_1 = arith.constant 0 : index
    %0 = vector.load %arg1[%c0, %c0_0, %c0_1] : memref<4x32x576xbf16, #tpu.memory_space<vmem>>, vector<4x32x576xbf16>
    %1 = vector.shape_cast %0 : vector<4x32x576xbf16> to vector<128x576xbf16>
    %c0_2 = arith.constant 0 : index
    %c0_3 = arith.constant 0 : index
    %2 = vector.load %arg2[%c0_2, %c0_3] : memref<576x128xbf16, #tpu.memory_space<vmem>>, vector<576x128xbf16>
    %cst = arith.constant dense<0.000000e+00> : vector<128x128xf32>
    %3 = tpu.matmul %1, %2, %cst {dimension_numbers = #tpu.dot_dimension_numbers<[1], [0], [0], [1], [0, 0, 1, 1], [], []>} : vector<128x576xbf16>, vector<576x128xbf16>, vector<128x128xf32> -> vector<128x128xf32>
    %4 = vector.shape_cast %3 : vector<128x128xf32> to vector<4x32x128xf32>
    %cst_4 = arith.constant dense<0xFF800000> : vector<32x128xf32>
    %5 = vector.multi_reduction <maximumf>, %4, %cst_4 [0] : vector<4x32x128xf32> to vector<32x128xf32>
    %c0_5 = arith.constant 0 : index
    %c0_6 = arith.constant 0 : index
    %6 = vector.load %arg3[%c0_5, %c0_6] : memref<1x128xf32, #tpu.memory_space<vmem>>, vector<1x128xf32>
    %7 = vector.broadcast %6 : vector<1x128xf32> to vector<32x128xf32>
    %8 = arith.addf %5, %7 : vector<32x128xf32>
    %cst_7 = arith.constant 0.000000e+00 : f32
    %9 = vector.broadcast %cst_7 : f32 to vector<32x128xf32>
    %10 = arith.maximumf %8, %9 : vector<32x128xf32>
    %c0_8 = arith.constant 0 : index
    %c0_9 = arith.constant 0 : index
    %11 = vector.load %arg4[%c0_8, %c0_9] : memref<32x128xf32, #tpu.memory_space<vmem>>, vector<32x128xf32>
    tpu.vector_store %arg4[%c0_8, %c0_9], %10 {strides = array<i32>} : memref<32x128xf32, #tpu.memory_space<vmem>>, vector<32x128xf32>,
    return
  }
  func.func @transform_0(%arg0: i32) -> (i32, i32, i32) {
    %c0_i32 = arith.constant 0 : i32
    %c0_i32_0 = arith.constant 0 : i32
    %c0_i32_1 = arith.constant 0 : i32
    return %c0_i32, %arg0, %c0_i32_0 : i32, i32, i32
  }
  func.func @transform_1(%arg0: i32) -> (i32, i32) {
    %c0_i32 = arith.constant 0 : i32
    %c0_i32_0 = arith.constant 0 : i32
    %c0_i32_1 = arith.constant 0 : i32
    return %c0_i32, %c0_i32_0 : i32, i32
  }
  func.func @transform_2(%arg0: i32) -> (i32, i32) {
    %c0_i32 = arith.constant 0 : i32
    %c0_i32_0 = arith.constant 0 : i32
    %c0_i32_1 = arith.constant 0 : i32
    return %c0_i32, %c0_i32_0 : i32, i32
  }
  func.func @transform_3(%arg0: i32) -> (i32, i32) {
    %c0_i32 = arith.constant 0 : i32
    %c0_i32_0 = arith.constant 0 : i32
    return %arg0, %c0_i32 : i32, i32
  }
}

module attributes {stable_mosaic.version = 11 : i64} {
  func.func @conv_bn_relu_pool_kernel(%arg0: i32, %arg1: memref<4x8x1152xbf16, #tpu.memory_space<vmem>>, %arg2: memref<1152x256xbf16, #tpu.memory_space<vmem>>, %arg3: memref<1x256xf32, #tpu.memory_space<vmem>>, %arg4: memref<8x256xf32, #tpu.memory_space<vmem>>) attributes {dimension_semantics = [#tpu.dimension_semantics<parallel>], iteration_bounds = array<i64: 1>, scalar_prefetch = 0 : i64, scratch_operands = 0 : i64, tpu.core_type = #tpu.core_type<tc>, window_params = [{transform_indices = @transform_0, window_bounds = array<i64: 4, 8, 1152>}, {pipeline_mode = #tpu.pipeline_mode<synchronous>, transform_indices = @transform_1, window_bounds = array<i64: 1152, 256>}, {pipeline_mode = #tpu.pipeline_mode<synchronous>, transform_indices = @transform_2, window_bounds = array<i64: 1, 256>}, {transform_indices = @transform_3, window_bounds = array<i64: 8, 256>}]} {
    %c0 = arith.constant 0 : index
    %c0_0 = arith.constant 0 : index
    %c0_1 = arith.constant 0 : index
    %0 = vector.load %arg1[%c0, %c0_0, %c0_1] : memref<4x8x1152xbf16, #tpu.memory_space<vmem>>, vector<4x8x1152xbf16>
    %1 = vector.shape_cast %0 : vector<4x8x1152xbf16> to vector<32x1152xbf16>
    %c0_2 = arith.constant 0 : index
    %c0_3 = arith.constant 0 : index
    %2 = vector.load %arg2[%c0_2, %c0_3] : memref<1152x256xbf16, #tpu.memory_space<vmem>>, vector<1152x256xbf16>
    %cst = arith.constant dense<0.000000e+00> : vector<32x256xf32>
    %3 = tpu.matmul %1, %2, %cst {dimension_numbers = #tpu.dot_dimension_numbers<[1], [0], [0], [1], [0, 0, 1, 1], [], []>} : vector<32x1152xbf16>, vector<1152x256xbf16>, vector<32x256xf32> -> vector<32x256xf32>
    %4 = vector.shape_cast %3 : vector<32x256xf32> to vector<4x8x256xf32>
    %cst_4 = arith.constant dense<0xFF800000> : vector<8x256xf32>
    %5 = vector.multi_reduction <maximumf>, %4, %cst_4 [0] : vector<4x8x256xf32> to vector<8x256xf32>
    %c0_5 = arith.constant 0 : index
    %c0_6 = arith.constant 0 : index
    %6 = vector.load %arg3[%c0_5, %c0_6] : memref<1x256xf32, #tpu.memory_space<vmem>>, vector<1x256xf32>
    %7 = vector.broadcast %6 : vector<1x256xf32> to vector<8x256xf32>
    %8 = arith.addf %5, %7 : vector<8x256xf32>
    %cst_7 = arith.constant 0.000000e+00 : f32
    %9 = vector.broadcast %cst_7 : f32 to vector<8x256xf32>
    %10 = arith.maximumf %8, %9 : vector<8x256xf32>
    %c0_8 = arith.constant 0 : index
    %c0_9 = arith.constant 0 : index
    %11 = vector.load %arg4[%c0_8, %c0_9] : memref<8x256xf32, #tpu.memory_space<vmem>>, vector<8x256xf32>
    tpu.vector_store %arg4[%c0_8, %c0_9], %10 {strides = array<i32>} : memref<8x256xf32, #tpu.memory_space<vmem>>, vector<8x256xf32>,
    return
  }
  func.func @transform_0(%arg0: i32) -> (i32, i32, i32) {
    %c0_i32 = arith.constant 0 : i32
    %c0_i32_0 = arith.constant 0 : i32
    %c0_i32_1 = arith.constant 0 : i32
    return %c0_i32, %arg0, %c0_i32_0 : i32, i32, i32
  }
  func.func @transform_1(%arg0: i32) -> (i32, i32) {
    %c0_i32 = arith.constant 0 : i32
    %c0_i32_0 = arith.constant 0 : i32
    %c0_i32_1 = arith.constant 0 : i32
    return %c0_i32, %c0_i32_0 : i32, i32
  }
  func.func @transform_2(%arg0: i32) -> (i32, i32) {
    %c0_i32 = arith.constant 0 : i32
    %c0_i32_0 = arith.constant 0 : i32
    %c0_i32_1 = arith.constant 0 : i32
    return %c0_i32, %c0_i32_0 : i32, i32
  }
  func.func @transform_3(%arg0: i32) -> (i32, i32) {
    %c0_i32 = arith.constant 0 : i32
    %c0_i32_0 = arith.constant 0 : i32
    return %arg0, %c0_i32 : i32, i32
  }
}

module attributes {stable_mosaic.version = 11 : i64} {
  func.func @head_kernel(%arg0: i32, %arg1: memref<8x4x256xf32, #tpu.memory_space<vmem>>, %arg2: memref<256x512xf32, #tpu.memory_space<vmem>>, %arg3: memref<1x512xf32, #tpu.memory_space<vmem>>, %arg4: memref<512x38xf32, #tpu.memory_space<vmem>>, %arg5: memref<1x38xf32, #tpu.memory_space<vmem>>, %arg6: memref<8x38xf32, #tpu.memory_space<vmem>>) attributes {dimension_semantics = [#tpu.dimension_semantics<parallel>], iteration_bounds = array<i64: 1>, scalar_prefetch = 0 : i64, scratch_operands = 0 : i64, tpu.core_type = #tpu.core_type<tc>, window_params = [{transform_indices = @transform_0, window_bounds = array<i64: 8, 4, 256>}, {pipeline_mode = #tpu.pipeline_mode<synchronous>, transform_indices = @transform_1, window_bounds = array<i64: 256, 512>}, {pipeline_mode = #tpu.pipeline_mode<synchronous>, transform_indices = @transform_2, window_bounds = array<i64: 1, 512>}, {pipeline_mode = #tpu.pipeline_mode<synchronous>, transform_indices = @transform_3, window_bounds = array<i64: 512, 38>}, {pipeline_mode = #tpu.pipeline_mode<synchronous>, transform_indices = @transform_4, window_bounds = array<i64: 1, 38>}, {transform_indices = @transform_5, window_bounds = array<i64: 8, 38>}]} {
    %c0 = arith.constant 0 : index
    %c0_0 = arith.constant 0 : index
    %c0_1 = arith.constant 0 : index
    %0 = vector.load %arg1[%c0, %c0_0, %c0_1] : memref<8x4x256xf32, #tpu.memory_space<vmem>>, vector<8x4x256xf32>
    %cst = arith.constant dense<0.000000e+00> : vector<8x256xf32>
    %1 = vector.multi_reduction <add>, %0, %cst [1] : vector<8x4x256xf32> to vector<8x256xf32>
    %cst_2 = arith.constant 4.000000e+00 : f32
    %2 = vector.broadcast %cst_2 : f32 to vector<8x256xf32>
    %3 = arith.divf %1, %2 : vector<8x256xf32>
    %c0_3 = arith.constant 0 : index
    %c0_4 = arith.constant 0 : index
    %4 = vector.load %arg2[%c0_3, %c0_4] : memref<256x512xf32, #tpu.memory_space<vmem>>, vector<256x512xf32>
    %cst_5 = arith.constant dense<0.000000e+00> : vector<8x512xf32>
    %5 = tpu.matmul %3, %4, %cst_5 {dimension_numbers = #tpu.dot_dimension_numbers<[1], [0], [0], [1], [0, 0, 1, 1], [], []>} : vector<8x256xf32>, vector<256x512xf32>, vector<8x512xf32> -> vector<8x512xf32>
    %c0_6 = arith.constant 0 : index
    %c0_7 = arith.constant 0 : index
    %6 = vector.load %arg3[%c0_6, %c0_7] : memref<1x512xf32, #tpu.memory_space<vmem>>, vector<1x512xf32>
    %7 = vector.broadcast %6 : vector<1x512xf32> to vector<8x512xf32>
    %8 = arith.addf %5, %7 : vector<8x512xf32>
    %cst_8 = arith.constant 0.000000e+00 : f32
    %9 = vector.broadcast %cst_8 : f32 to vector<8x512xf32>
    %10 = arith.maximumf %8, %9 : vector<8x512xf32>
    %c0_9 = arith.constant 0 : index
    %c0_10 = arith.constant 0 : index
    %11 = vector.load %arg4[%c0_9, %c0_10] : memref<512x38xf32, #tpu.memory_space<vmem>>, vector<512x38xf32>
    %cst_11 = arith.constant dense<0.000000e+00> : vector<8x38xf32>
    %12 = tpu.matmul %10, %11, %cst_11 {dimension_numbers = #tpu.dot_dimension_numbers<[1], [0], [0], [1], [0, 0, 1, 1], [], []>} : vector<8x512xf32>, vector<512x38xf32>, vector<8x38xf32> -> vector<8x38xf32>
    %c0_12 = arith.constant 0 : index
    %c0_13 = arith.constant 0 : index
    %13 = vector.load %arg5[%c0_12, %c0_13] : memref<1x38xf32, #tpu.memory_space<vmem>>, vector<1x38xf32>
    %14 = vector.broadcast %13 : vector<1x38xf32> to vector<8x38xf32>
    %15 = arith.addf %12, %14 : vector<8x38xf32>
    %c0_14 = arith.constant 0 : index
    %c0_15 = arith.constant 0 : index
    %16 = vector.load %arg6[%c0_14, %c0_15] : memref<8x38xf32, #tpu.memory_space<vmem>>, vector<8x38xf32>
    tpu.vector_store %arg6[%c0_14, %c0_15], %15 {strides = array<i32>} : memref<8x38xf32, #tpu.memory_space<vmem>>, vector<8x38xf32>,
    return
  }
  func.func @transform_0(%arg0: i32) -> (i32, i32, i32) {
    %c0_i32 = arith.constant 0 : i32
    %c0_i32_0 = arith.constant 0 : i32
    %c0_i32_1 = arith.constant 0 : i32
    return %arg0, %c0_i32, %c0_i32_0 : i32, i32, i32
  }
  func.func @transform_1(%arg0: i32) -> (i32, i32) {
    %c0_i32 = arith.constant 0 : i32
    %c0_i32_0 = arith.constant 0 : i32
    %c0_i32_1 = arith.constant 0 : i32
    return %c0_i32, %c0_i32_0 : i32, i32
  }
  func.func @transform_2(%arg0: i32) -> (i32, i32) {
    %c0_i32 = arith.constant 0 : i32
    %c0_i32_0 = arith.constant 0 : i32
    %c0_i32_1 = arith.constant 0 : i32
    return %c0_i32, %c0_i32_0 : i32, i32
  }
  func.func @transform_3(%arg0: i32) -> (i32, i32) {
    %c0_i32 = arith.constant 0 : i32
    %c0_i32_0 = arith.constant 0 : i32
    %c0_i32_1 = arith.constant 0 : i32
    return %c0_i32, %c0_i32_0 : i32, i32
  }
  func.func @transform_4(%arg0: i32) -> (i32, i32) {
    %c0_i32 = arith.constant 0 : i32
    %c0_i32_0 = arith.constant 0 : i32
    %c0_i32_1 = arith.constant 0 : i32
    return %c0_i32, %c0_i32_0 : i32, i32
  }
  func.func @transform_5(%arg0: i32) -> (i32, i32) {
    %c0_i32 = arith.constant 0 : i32
    %c0_i32_0 = arith.constant 0 : i32
    return %arg0, %c0_i32 : i32, i32
  }
}

</mosaic_0001>

<bundles_post_ra>
// kernel: forward.4
= control target key start
LH: loop header
LB: loop body
LE: loop exit
PB: predicated region body
PF: predicated region fallthrough
CT: control target
= control target key end

     0   :  { %vm351_vm0 = vcmask 1044480   ;;  %vm352_vm1 = vcmask 1045504   ;;  %vm254_vm2 = vcmask 220160   ;;  %v1027_v1 = vmov 65535   ;;  %s1394_s1 = inlined_call_operand.vmem [shape: bf16[27,64], index: 1, kind: input, shape index: {}]   ;;  %s1395_s0 = inlined_call_operand.vmem [shape: bf16[4,128,27], index: 0, kind: input, shape index: {}]   ;;  %s1396_s2 = inlined_call_operand.vmem [shape: f32[1,64], index: 2, kind: input, shape index: {}]   ;;  %s1397_s3 = inlined_call_operand.vmem [shape: f32[128,64], index: 3, kind: output, shape index: {}]  }
   0x1   :  { %v993_v0 = vld [vmem:[%s1394_s1] sm:$0xff]   ;;  %v353_v2 = vsel %vm351_vm0, 4294967295, %v1027_v1  ;;  %v994_v3 = vld [vmem:[%s1394_s1 + $0x8] sm:$0x3f]   ;;  %v999_v10 = vld [vmem:[%s1395_s0 + $0x10] sm:$0xff]   ;;  %vm647_vm3 = vcmask 523264  }
   0x2   :  { %920 = vmatprep.subr.bf16.mxu0 %v993_v0  ;;  %988 = vmatprep.subr.bf16.mxu1 %v993_v0  ;;  %v354_v4 = vsel %vm352_vm1, %v353_v2, 0  ;;  %v995_v5 = vld [vmem:[%s1395_s0] sm:$0xff]   ;;  %v996_v8 = vld [vmem:[%s1395_s0 + $0x8] sm:$0xff]   ;;  %v1001_v11 = vld [vmem:[%s1395_s0 + $0x90] sm:$0xff]  }
   0x3   :  { %921 = vmatpush3.bf16.msra.mxu0 %v993_v0  ;;  %990 = vmatpush3.bf16.msra.mxu1 %v993_v0  ;;  %v356_v6 = vand.u32 %v994_v3, %v354_v4  ;;  %v997_v7 = vld [vmem:[%s1395_s0 + $0x80] sm:$0xff]   ;;  %v998_v9 = vld [vmem:[%s1395_s0 + $0x88] sm:$0xff]   ;;  %v1000_v12 = vld [vmem:[%s1395_s0 + $0x18] sm:$0xff]  }
   0x4   :  { %924 = vmatprep.mubr.msk.bf16.mxu0 %vm254_vm2, %v995_v5  ;;  %956 = vmatprep.mubr.msk.bf16.mxu1 %vm254_vm2, %v997_v7  ;;  %v1002_v13 = vld [vmem:[%s1395_s0 + $0x98] sm:$0xff]   ;;  %v1003_v14 = vld [vmem:[%s1395_s0 + $0x20] sm:$0xff]   ;;  %v1004_v16 = vld [vmem:[%s1395_s0 + $0x28] sm:$0xff]  }
   0x5   :  { %922 = vmatprep.subr.bf16.mxu0 %v356_v6  ;;  %989 = vmatprep.subr.bf16.mxu1 %v356_v6  ;;  %v1005_v15 = vld [vmem:[%s1395_s0 + $0xa0] sm:$0xff]   ;;  %v1006_v17 = vld [vmem:[%s1395_s0 + $0xa8] sm:$0xff]   ;;  %v1007_v18 = vld [vmem:[%s1395_s0 + $0x30] sm:$0xff]  }
   0x6   :  { %v1009_v19 = vld [vmem:[%s1395_s0 + $0xb0] sm:$0xff]   ;;  %v1008_v20 = vld [vmem:[%s1395_s0 + $0x38] sm:$0xff]   ;;  %v1011_v22 = vld [vmem:[%s1395_s0 + $0x40] sm:$0xff]  }
   0x7   :  { %923 = vmatpush3.bf16.msra.mxu0 %v356_v6  ;;  %991 = vmatpush3.bf16.msra.mxu1 %v356_v6  ;;  %v1010_v21 = vld [vmem:[%s1395_s0 + $0xb8] sm:$0xff]   ;;  %v1013_v23 = vld [vmem:[%s1395_s0 + $0xc0] sm:$0xff]   ;;  %v1012_v24 = vld [vmem:[%s1395_s0 + $0x48] sm:$0xff]  }
   0x8   :  { %v1014_v25 = vld [vmem:[%s1395_s0 + $0xc8] sm:$0xff]   ;;  %v1015_v26 = vld [vmem:[%s1395_s0 + $0x50] sm:$0xff]   ;;  %v1016_v28 = vld [vmem:[%s1395_s0 + $0x58] sm:$0xff]  }
   0x9   :  { %v1017_v27 = vld [vmem:[%s1395_s0 + $0xd0] sm:$0xff]   ;;  %v1018_v29 = vld [vmem:[%s1395_s0 + $0xd8] sm:$0xff]   ;;  %v1019_v30 = vld [vmem:[%s1395_s0 + $0x60] sm:$0xff]  }
   0xa   :  { %925 = vmatmul.mubr.msk.bf16.vlgmr.msra.gmra.mrb[0].mxu0 %vm254_vm2, %v996_v8  ;;  %957 = vmatmul.mubr.msk.bf16.vlgmr.msra.gmra.mrb[0].mxu1 %vm254_vm2, %v998_v9  ;;  %v1021_v31 = vld [vmem:[%s1395_s0 + $0xe0] sm:$0xff]   ;;  %v1020_v32 = vld [vmem:[%s1395_s0 + $0x68] sm:$0xff]   ;;  %v1023_v34 = vld [vmem:[%s1395_s0 + $0x70] sm:$0xff]  }
   0xb   :  { %928 = vmatprep.mubr.msk.bf16.mxu0 %vm254_vm2, %v999_v10  ;;  %960 = vmatprep.mubr.msk.bf16.mxu1 %vm254_vm2, %v1001_v11  ;;  %v1022_v33 = vld [vmem:[%s1395_s0 + $0xe8] sm:$0xff]   ;;  %v1025_v35 = vld [vmem:[%s1395_s0 + $0xf0] sm:$0xff]   ;;  %v1024_v36 = vld [vmem:[%s1395_s0 + $0x78] sm:$0xff]  }
   0xc   :  { %v1026_v37 = vld [vmem:[%s1395_s0 + $0xf8] sm:$0xff]  }
  0x12   :  { %929 = vmatmul.mubr.msk.bf16.gmra.mrb[4].mxu0 %vm254_vm2, %v1000_v12  ;;  %961 = vmatmul.mubr.msk.bf16.gmra.mrb[4].mxu1 %vm254_vm2, %v1002_v13 }
  0x13   :  { %932 = vmatprep.mubr.msk.bf16.mxu0 %vm254_vm2, %v1003_v14  ;;  %964 = vmatprep.mubr.msk.bf16.mxu1 %vm254_vm2, %v1005_v15 }
  0x1a   :  { %933 = vmatmul.mubr.msk.bf16.gmra.mrb[8].mxu0 %vm254_vm2, %v1004_v16  ;;  %965 = vmatmul.mubr.msk.bf16.gmra.mrb[8].mxu1 %vm254_vm2, %v1006_v17 }
  0x1b   :  { %936 = vmatprep.mubr.msk.bf16.mxu0 %vm254_vm2, %v1007_v18  ;;  %968 = vmatprep.mubr.msk.bf16.mxu1 %vm254_vm2, %v1009_v19 }
  0x22   :  { %937 = vmatmul.mubr.msk.bf16.gmra.mrb[12].mxu0 %vm254_vm2, %v1008_v20  ;;  %969 = vmatmul.mubr.msk.bf16.gmra.mrb[12].mxu1 %vm254_vm2, %v1010_v21 }
  0x23   :  { %940 = vmatprep.mubr.msk.bf16.mxu0 %vm254_vm2, %v1011_v22  ;;  %972 = vmatprep.mubr.msk.bf16.mxu1 %vm254_vm2, %v1013_v23 }
  0x2a   :  { %941 = vmatmul.mubr.msk.bf16.gmra.mrb[16].mxu0 %vm254_vm2, %v1012_v24  ;;  %973 = vmatmul.mubr.msk.bf16.gmra.mrb[16].mxu1 %vm254_vm2, %v1014_v25 }
  0x2b   :  { %944 = vmatprep.mubr.msk.bf16.mxu0 %vm254_vm2, %v1015_v26  ;;  %976 = vmatprep.mubr.msk.bf16.mxu1 %vm254_vm2, %v1017_v27 }
  0x32   :  { %945 = vmatmul.mubr.msk.bf16.gmra.mrb[20].mxu0 %vm254_vm2, %v1016_v28  ;;  %977 = vmatmul.mubr.msk.bf16.gmra.mrb[20].mxu1 %vm254_vm2, %v1018_v29 }
  0x33   :  { %948 = vmatprep.mubr.msk.bf16.mxu0 %vm254_vm2, %v1019_v30  ;;  %980 = vmatprep.mubr.msk.bf16.mxu1 %vm254_vm2, %v1021_v31 }
  0x3a   :  { %949 = vmatmul.mubr.msk.bf16.gmra.mrb[24].mxu0 %vm254_vm2, %v1020_v32  ;;  %981 = vmatmul.mubr.msk.bf16.gmra.mrb[24].mxu1 %vm254_vm2, %v1022_v33 }
  0x3b   :  { %952 = vmatprep.mubr.msk.bf16.mxu0 %vm254_vm2, %v1023_v34  ;;  %984 = vmatprep.mubr.msk.bf16.mxu1 %vm254_vm2, %v1025_v35 }
  0x42   :  { %953 = vmatmul.mubr.msk.bf16.gmra.mrb[28].mxu0 %vm254_vm2, %v1024_v36  ;;  %985 = vmatmul.mubr.msk.bf16.gmra.mrb[28].mxu1 %vm254_vm2, %v1026_v37 }
  0xdd   :  { %v926_v38 = vpop.f32.mrb[0].mxu0  ;;  %v958_v39 = vpop.f32.mrb[0].mxu1 }
  0xde   :  { %v392_v40 = vpop.f32.mrb[1].mxu0  ;;  %v520_v41 = vpop.f32.mrb[1].mxu1  ;;  %v662_v6 = vsel %vm647_vm3, %v926_v38, -inf  ;;  %v665_v8 = vsel %vm647_vm3, %v958_v39, -inf }
  0xdf   :  { %v927_v42 = vpop.f32.mrb[2].mxu0  ;;  %v959_v43 = vpop.f32.mrb[2].mxu1  ;;  %v648_v7 = vsel %vm647_vm3, %v392_v40, -inf  ;;  %v651_v9 = vsel %vm647_vm3, %v520_v41, -inf  ;;  %v1237_v40 = vld [vmem:[%s1396_s2] ss:$0 sm:$0xff] }
  0xe0   :  { %v395_v44 = vpop.f32.mrb[3].mxu0  ;;  %v523_v45 = vpop.f32.mrb[3].mxu1  ;;  %v669_v10 = vsel %vm647_vm3, %v927_v42, -inf  ;;  %v672_v12 = vsel %vm647_vm3, %v959_v43, -inf }
  0xe1   :  { %v655_v11 = vsel %vm647_vm3, %v395_v44, -inf  ;;  %v658_v13 = vsel %vm647_vm3, %v523_v45, -inf }
  0xe5   :  { %v930_v46 = vpop.f32.mrb[4].mxu0  ;;  %v962_v47 = vpop.f32.mrb[4].mxu1 }
  0xe6   :  { %v408_v48 = vpop.f32.mrb[5].mxu0  ;;  %v536_v49 = vpop.f32.mrb[5].mxu1  ;;  %v1215_v16 = vsel %vm647_vm3, %v930_v46, -inf  ;;  %v693_v18 = vsel %vm647_vm3, %v962_v47, -inf }
  0xe7   :  { %v931_v50 = vpop.f32.mrb[6].mxu0  ;;  %v963_v51 = vpop.f32.mrb[6].mxu1  ;;  %v1218_v17 = vsel %vm647_vm3, %v408_v48, -inf  ;;  %v679_v23 = vsel %vm647_vm3, %v536_v49, -inf }
  0xe8   :  { %v411_v52 = vpop.f32.mrb[7].mxu0  ;;  %v539_v53 = vpop.f32.mrb[7].mxu1  ;;  %v1223_v22 = vsel %vm647_vm3, %v931_v50, -inf  ;;  %v700_v28 = vsel %vm647_vm3, %v963_v51, -inf }
  0xe9   :  { %v683_v38 = vsel %vm647_vm3, %v411_v52, -inf  ;;  %v686_v39 = vsel %vm647_vm3, %v539_v53, -inf }
  0xed   :  { %v934_v54 = vpop.f32.mrb[8].mxu0  ;;  %v966_v55 = vpop.f32.mrb[8].mxu1 }
  0xee   :  { %v424_v56 = vpop.f32.mrb[9].mxu0  ;;  %v552_v57 = vpop.f32.mrb[9].mxu1  ;;  %v1240_v43 = vsel %vm647_vm3, %v934_v54, -inf  ;;  %v1243_v44 = vsel %vm647_vm3, %v966_v55, -inf }
  0xef   :  { %v1182_v58 = vpop.f32.mrb[10].mxu0  ;;  %v1184_v59 = vpop.f32.mrb[10].mxu1  ;;  %v1246_v47 = vsel %vm647_vm3, %v424_v56, -inf  ;;  %v1250_v51 = vsel %vm647_vm3, %v552_v57, -inf }
  0xf0   :  { %v1186_v60 = vpop.f32.mrb[11].mxu0  ;;  %v1188_v61 = vpop.f32.mrb[11].mxu1 }
  0xf5   :  { %v1190_v62 = vpop.f32.mrb[12].mxu0  ;;  %v1192_v63 = vpop.f32.mrb[12].mxu1 }
  0xf6   :  { %v1194_v0 = vpop.f32.mrb[13].mxu0  ;;  %v1196_v1 = vpop.f32.mrb[13].mxu1 }
  0xf7   :  { %v1198_v2 = vpop.f32.mrb[14].mxu0  ;;  %v1200_v3 = vpop.f32.mrb[14].mxu1 }
  0xf8   :  { %v1202_v4 = vpop.f32.mrb[15].mxu0  ;;  %v1204_v5 = vpop.f32.mrb[15].mxu1 }
  0xfd   :  { %v942_v14 = vpop.f32.mrb[16].mxu0  ;;  %v974_v15 = vpop.f32.mrb[16].mxu1 }
  0xfe   :  { %v663_v19 = vsel %vm647_vm3, %v942_v14, -inf  ;;  %v456_v20 = vpop.f32.mrb[17].mxu0  ;;  %v584_v21 = vpop.f32.mrb[17].mxu1  ;;  %v667_v30 = vsel %vm647_vm3, %v974_v15, -inf }
  0xff   :  { %v664_v24 = vmax.f32 %v662_v6, %v663_v19  ;;  %v649_v25 = vsel %vm647_vm3, %v456_v20, -inf  ;;  %v943_v26 = vpop.f32.mrb[18].mxu0  ;;  %v975_v27 = vpop.f32.mrb[18].mxu1  ;;  %v653_v36 = vsel %vm647_vm3, %v584_v21, -inf }
 0x100   :  { %v650_v29 = vmax.f32 %v648_v7, %v649_v25  ;;  %v670_v31 = vsel %vm647_vm3, %v943_v26, -inf  ;;  %v459_v32 = vpop.f32.mrb[19].mxu0  ;;  %v587_v33 = vpop.f32.mrb[19].mxu1  ;;  %v674_v49 = vsel %vm647_vm3, %v975_v27, -inf }
 0x101   :  { %v666_v34 = vmax.f32 %v664_v24, %v665_v8  ;;  %v671_v35 = vmax.f32 %v669_v10, %v670_v31  ;;  %v656_v37 = vsel %vm647_vm3, %v459_v32, -inf  ;;  %v660_v54 = vsel %vm647_vm3, %v587_v33, -inf }
 0x102   :  { %v652_v41 = vmax.f32 %v650_v29, %v651_v9  ;;  %v657_v42 = vmax.f32 %v655_v11, %v656_v37  ;;  %v725_v32 = vsel %vm647_vm3, %v1182_v58, -inf  ;;  %v714_v37 = vsel %vm647_vm3, %v1188_v61, -inf }
 0x103   :  { %v668_v45 = vmax.f32 %v666_v34, %v667_v30  ;;  %v673_v46 = vmax.f32 %v671_v35, %v672_v12  ;;  %v728_v35 = vsel %vm647_vm3, %v1184_v59, -inf  ;;  %v1298_v61 = vsel %vm647_vm3, %v1192_v63, -inf }
 0x104   :  { %v654_v48 = vmax.f32 %v652_v41, %v653_v36  ;;  %v659_v50 = vmax.f32 %v657_v42, %v658_v13  ;;  %v711_v36 = vsel %vm647_vm3, %v1186_v60, -inf  ;;  %v1293_v41 = vsel %vm647_vm3, %v1190_v62, -inf }
 0x105   :  { %v769_v52 = vadd.f32 %v1237_v40, %v668_v45  ;;  %v675_v53 = vmax.f32 %v673_v46, %v674_v49  ;;  %v946_v6 = vpop.f32.mrb[20].mxu0  ;;  %v978_v55 = vpop.f32.mrb[20].mxu1 }
 0x106   :  { %v767_v7 = vadd.f32 %v1237_v40, %v654_v48  ;;  %v661_v8 = vmax.f32 %v659_v50, %v660_v54  ;;  %v691_v56 = vsel %vm647_vm3, %v946_v6, -inf  ;;  %v472_v9 = vpop.f32.mrb[21].mxu0  ;;  %v695_v10 = vsel %vm647_vm3, %v978_v55, -inf  ;;  %v600_v11 = vpop.f32.mrb[21].mxu1 }
 0x107   :  { %v785_v12 = vmax.f32 %v769_v52, 0.0  ;;  %v770_v57 = vadd.f32 %v1237_v40, %v675_v53  ;;  %v692_v13 = vmax.f32 %v1215_v16, %v691_v56  ;;  %v677_v14 = vsel %vm647_vm3, %v472_v9, -inf  ;;  %v947_v15 = vpop.f32.mrb[22].mxu0  ;;  %v979_v19 = vpop.f32.mrb[22].mxu1 }
 0x108   :  { %v783_v20 = vmax.f32 %v767_v7, 0.0  ;;  %v768_v21 = vadd.f32 %v1237_v40, %v661_v8  ;;  %v678_v24 = vmax.f32 %v1218_v17, %v677_v14  ;;  %v698_v25 = vsel %vm647_vm3, %v947_v15, -inf  ;;  %v475_v26 = vpop.f32.mrb[23].mxu0  ;;  %v603_v27 = vpop.f32.mrb[23].mxu1 }
 0x109   :  { %801 = vst.msk [vmem:[%s1397_s3 + $0x10] sm:$0xff] %vm647_vm3, %v785_v12  ;;  %v786_v29 = vmax.f32 %v770_v57, 0.0  ;;  %v694_v16 = vmax.f32 %v692_v13, %v693_v18  ;;  %v699_v30 = vmax.f32 %v1223_v22, %v698_v25  ;;  %v681_v31 = vsel %vm647_vm3, %v600_v11, -inf }
 0x10a   :  { %799 = vst.msk [vmem:[%s1397_s3] sm:$0xff] %vm647_vm3, %v783_v20  ;;  %v784_v17 = vmax.f32 %v768_v21, 0.0  ;;  %v680_v33 = vmax.f32 %v678_v24, %v679_v23  ;;  %v684_v34 = vsel %vm647_vm3, %v475_v26, -inf  ;;  %v702_v23 = vsel %vm647_vm3, %v979_v19, -inf }
 0x10b   :  { %802 = vst.msk [vmem:[%s1397_s3 + $0x18] sm:$0xff] %vm647_vm3, %v786_v29  ;;  %v696_v18 = vmax.f32 %v694_v16, %v695_v10  ;;  %v685_v22 = vmax.f32 %v683_v38, %v684_v34  ;;  %v701_v58 = vmax.f32 %v699_v30, %v700_v28  ;;  %v688_v48 = vsel %vm647_vm3, %v603_v27, -inf }
 0x10c   :  { %800 = vst.msk [vmem:[%s1397_s3 + $0x8] sm:$0xff] %vm647_vm3, %v784_v17  ;;  %v682_v59 = vmax.f32 %v680_v33, %v681_v31  ;;  %v732_v13 = vsel %vm647_vm3, %v1194_v0, -inf  ;;  %v753_v21 = vsel %vm647_vm3, %v1198_v2, -inf  ;;  %v735_v24 = vsel %vm647_vm3, %v1196_v1, -inf }
 0x10d   :  { %v773_v28 = vadd.f32 %v1237_v40, %v696_v18  ;;  %v703_v38 = vmax.f32 %v701_v58, %v702_v23  ;;  %v687_v42 = vmax.f32 %v685_v22, %v686_v39  ;;  %v950_v60 = vpop.f32.mrb[24].mxu0  ;;  %v982_v45 = vpop.f32.mrb[24].mxu1  ;;  %v756_v25 = vsel %vm647_vm3, %v1200_v3, -inf }
 0x10e   :  { %v771_v46 = vadd.f32 %v1237_v40, %v682_v59  ;;  %v719_v49 = vsel %vm647_vm3, %v950_v60, -inf  ;;  %v488_v50 = vpop.f32.mrb[25].mxu0  ;;  %v616_v52 = vpop.f32.mrb[25].mxu1  ;;  %v723_v8 = vsel %vm647_vm3, %v982_v45, -inf  ;;  %v739_v1 = vsel %vm647_vm3, %v1202_v4, -inf }
 0x10f   :  { %v789_v62 = vmax.f32 %v773_v28, 0.0  ;;  %v774_v53 = vadd.f32 %v1237_v40, %v703_v38  ;;  %v689_v54 = vmax.f32 %v687_v42, %v688_v48  ;;  %v720_v39 = vmax.f32 %v1240_v43, %v719_v49  ;;  %v951_v6 = vpop.f32.mrb[26].mxu0  ;;  %v983_v55 = vpop.f32.mrb[26].mxu1 }
 0x110   :  { %v787_v7 = vmax.f32 %v771_v46, 0.0  ;;  %v705_v63 = vsel %vm647_vm3, %v488_v50, -inf  ;;  %v726_v56 = vsel %vm647_vm3, %v951_v6, -inf  ;;  %v491_v9 = vpop.f32.mrb[27].mxu0  ;;  %v619_v10 = vpop.f32.mrb[27].mxu1  ;;  %v709_v15 = vsel %vm647_vm3, %v616_v52, -inf }
 0x111   :  { %805 = vst.msk [vmem:[%s1397_s3 + $0x30] sm:$0xff] %vm647_vm3, %v789_v62  ;;  %v790_v11 = vmax.f32 %v774_v53, 0.0  ;;  %v772_v12 = vadd.f32 %v1237_v40, %v689_v54  ;;  %v706_v43 = vmax.f32 %v1246_v47, %v705_v63  ;;  %v722_v57 = vmax.f32 %v720_v39, %v1243_v44 }
 0x112   :  { %803 = vst.msk [vmem:[%s1397_s3 + $0x20] sm:$0xff] %vm647_vm3, %v787_v7  ;;  %v727_v14 = vmax.f32 %v725_v32, %v726_v56  ;;  %v712_v19 = vsel %vm647_vm3, %v491_v9, -inf  ;;  %v716_v3 = vsel %vm647_vm3, %v619_v10, -inf  ;;  %v742_v39 = vsel %vm647_vm3, %v1204_v5, -inf }
 0x113   :  { %806 = vst.msk [vmem:[%s1397_s3 + $0x38] sm:$0xff] %vm647_vm3, %v790_v11  ;;  %v788_v47 = vmax.f32 %v772_v12, 0.0  ;;  %v724_v44 = vmax.f32 %v722_v57, %v723_v8  ;;  %v708_v20 = vmax.f32 %v706_v43, %v1250_v51  ;;  %v713_v0 = vmax.f32 %v711_v36, %v712_v19 }
 0x114   :  { %v729_v26 = vmax.f32 %v727_v14, %v728_v35  ;;  %v730_v51 = vsel %vm647_vm3, %v983_v55, -inf }
 0x115   :  { %804 = vst.msk [vmem:[%s1397_s3 + $0x28] sm:$0xff] %vm647_vm3, %v788_v47  ;;  %v777_v27 = vadd.f32 %v1237_v40, %v724_v44  ;;  %v710_v29 = vmax.f32 %v708_v20, %v709_v15  ;;  %v715_v16 = vmax.f32 %v713_v0, %v714_v37  ;;  %v954_v30 = vpop.f32.mrb[28].mxu0  ;;  %v986_v2 = vpop.f32.mrb[28].mxu1 }
 0x116   :  { %v731_v31 = vmax.f32 %v729_v26, %v730_v51  ;;  %v747_v32 = vsel %vm647_vm3, %v954_v30, -inf  ;;  %v504_v17 = vpop.f32.mrb[29].mxu0  ;;  %v632_v33 = vpop.f32.mrb[29].mxu1  ;;  %v751_v4 = vsel %vm647_vm3, %v986_v2, -inf }
 0x117   :  { %v793_v34 = vmax.f32 %v777_v27, 0.0  ;;  %v775_v35 = vadd.f32 %v1237_v40, %v710_v29  ;;  %v717_v18 = vmax.f32 %v715_v16, %v716_v3  ;;  %v748_v22 = vmax.f32 %v1293_v41, %v747_v32  ;;  %v955_v58 = vpop.f32.mrb[30].mxu0  ;;  %v987_v36 = vpop.f32.mrb[30].mxu1 }
 0x118   :  { %v778_v37 = vadd.f32 %v1237_v40, %v731_v31  ;;  %v733_v59 = vsel %vm647_vm3, %v504_v17, -inf  ;;  %v754_v23 = vsel %vm647_vm3, %v955_v58, -inf  ;;  %v507_v28 = vpop.f32.mrb[31].mxu0  ;;  %v635_v38 = vpop.f32.mrb[31].mxu1  ;;  %v737_v49 = vsel %vm647_vm3, %v632_v33, -inf }
 0x119   :  { %809 = vst.msk [vmem:[%s1397_s3 + $0x50] sm:$0xff] %vm647_vm3, %v793_v34  ;;  %v791_v42 = vmax.f32 %v775_v35, 0.0  ;;  %v776_v41 = vadd.f32 %v1237_v40, %v717_v18  ;;  %v734_v60 = vmax.f32 %v732_v13, %v733_v59  ;;  %v750_v45 = vmax.f32 %v748_v22, %v1298_v61 }
 0x11a   :  { %v794_v46 = vmax.f32 %v778_v37, 0.0  ;;  %v755_v48 = vmax.f32 %v753_v21, %v754_v23  ;;  %v740_v50 = vsel %vm647_vm3, %v507_v28, -inf  ;;  %v758_v7 = vsel %vm647_vm3, %v987_v36, -inf }
 0x11b   :  { %807 = vst.msk [vmem:[%s1397_s3 + $0x40] sm:$0xff] %vm647_vm3, %v791_v42  ;;  %v792_v52 = vmax.f32 %v776_v41, 0.0  ;;  %v752_v62 = vmax.f32 %v750_v45, %v751_v4  ;;  %v736_v53 = vmax.f32 %v734_v60, %v735_v24  ;;  %v741_v54 = vmax.f32 %v739_v1, %v740_v50 }
 0x11c   :  { %810 = vst.msk [vmem:[%s1397_s3 + $0x58] sm:$0xff] %vm647_vm3, %v794_v46  ;;  %v757_v61 = vmax.f32 %v755_v48, %v756_v25  ;;  %v744_v5 = vsel %vm647_vm3, %v635_v38, -inf }
 0x11d   :  { %808 = vst.msk [vmem:[%s1397_s3 + $0x48] sm:$0xff] %vm647_vm3, %v792_v52  ;;  %v781_v6 = vadd.f32 %v1237_v40, %v752_v62  ;;  %v738_v55 = vmax.f32 %v736_v53, %v737_v49  ;;  %v743_v63 = vmax.f32 %v741_v54, %v742_v39 }
 0x11e   :  { %v759_v8 = vmax.f32 %v757_v61, %v758_v7 }
 0x11f   :  { %v797_v56 = vmax.f32 %v781_v6, 0.0  ;;  %v779_v9 = vadd.f32 %v1237_v40, %v738_v55  ;;  %v745_v10 = vmax.f32 %v743_v63, %v744_v5 }
 0x120   :  { %v782_v11 = vadd.f32 %v1237_v40, %v759_v8 }
 0x121   :  { %813 = vst.msk [vmem:[%s1397_s3 + $0x70] sm:$0xff] %vm647_vm3, %v797_v56  ;;  %v795_v12 = vmax.f32 %v779_v9, 0.0  ;;  %v780_v43 = vadd.f32 %v1237_v40, %v745_v10 }
 0x122   :  { %v798_v57 = vmax.f32 %v782_v11, 0.0 }
 0x123   :  { %811 = vst.msk [vmem:[%s1397_s3 + $0x60] sm:$0xff] %vm647_vm3, %v795_v12  ;;  %v796_v13 = vmax.f32 %v780_v43, 0.0 }
 0x124   :  { %814 = vst.msk [vmem:[%s1397_s3 + $0x78] sm:$0xff] %vm647_vm3, %v798_v57 }
 0x125   :  { %812 = vst.msk [vmem:[%s1397_s3 + $0x68] sm:$0xff] %vm647_vm3, %v796_v13 }

// kernel: forward.5
= control target key start
LH: loop header
LB: loop body
LE: loop exit
PB: predicated region body
PF: predicated region fallthrough
CT: control target
= control target key end

     0   :  { %vm551_vm0 = vcmask 523264   ;;  %s1546_s1 = inlined_call_operand.vmem [shape: bf16[576,128], index: 1, kind: input, shape index: {}]   ;;  %s1547_s0 = inlined_call_operand.vmem [shape: bf16[4,32,576], index: 0, kind: input, shape index: {}]   ;;  %s1548_s2 = inlined_call_operand.vmem [shape: f32[1,128], index: 2, kind: input, shape index: {}]   ;;  %s1549_s3 = inlined_call_operand.vmem [shape: f32[32,128], index: 3, kind: output, shape index: {}]  }
   0x1   :  { %v1159_v0 = vld [vmem:[%s1546_s1 + $0x40] sm:$0xff]   ;;  %v1163_v4 = vld [vmem:[%s1546_s1 + $0x48] sm:$0xff]   ;;  %v1167_v8 = vld [vmem:[%s1546_s1 + $0x50] sm:$0xff]  }
   0x2   :  { %v1160_v1 = vld [vmem:[%s1546_s1 + $0xc0] sm:$0xff]   ;;  %987 = vmatprep.subr.bf16.mxu0 %v1159_v0  ;;  %v1164_v5 = vld [vmem:[%s1546_s1 + $0xc8] sm:$0xff]   ;;  %v1168_v9 = vld [vmem:[%s1546_s1 + $0xd0] sm:$0xff]  }
   0x3   :  { %v1161_v2 = vld [vmem:[%s1546_s1] sm:$0xff]   ;;  %1051 = vmatprep.subr.bf16.mxu1 %v1160_v1  ;;  %v1165_v6 = vld [vmem:[%s1546_s1 + $0x8] sm:$0xff]   ;;  %v1169_v10 = vld [vmem:[%s1546_s1 + $0x10] sm:$0xff]  }
   0x4   :  { %v1162_v3 = vld [vmem:[%s1546_s1 + $0x80] sm:$0xff]   ;;  %988 = vmatpush3.bf16.msra.mxu0 %v1161_v2  ;;  %v1166_v7 = vld [vmem:[%s1546_s1 + $0x88] sm:$0xff]   ;;  %v1170_v11 = vld [vmem:[%s1546_s1 + $0x90] sm:$0xff]  }
   0x5   :  { %1052 = vmatpush3.bf16.msra.mxu1 %v1162_v3  ;;  %989 = vmatprep.subr.bf16.mxu0 %v1163_v4  ;;  %v1171_v12 = vld [vmem:[%s1546_s1 + $0x58] sm:$0xff]   ;;  %v1175_v16 = vld [vmem:[%s1546_s1 + $0x60] sm:$0xff]   ;;  %v1179_v20 = vld [vmem:[%s1546_s1 + $0x68] sm:$0xff]  }
   0x6   :  { %1053 = vmatprep.subr.bf16.mxu1 %v1164_v5  ;;  %v1172_v13 = vld [vmem:[%s1546_s1 + $0xd8] sm:$0xff]   ;;  %v1176_v17 = vld [vmem:[%s1546_s1 + $0xe0] sm:$0xff]   ;;  %v1180_v21 = vld [vmem:[%s1546_s1 + $0xe8] sm:$0xff]  }
   0x7   :  { %v1173_v14 = vld [vmem:[%s1546_s1 + $0x18] sm:$0xff]   ;;  %v1177_v18 = vld [vmem:[%s1546_s1 + $0x20] sm:$0xff]   ;;  %v1181_v22 = vld [vmem:[%s1546_s1 + $0x28] sm:$0xff]  }
   0x8   :  { %990 = vmatpush3.bf16.msra.mxu0 %v1165_v6  ;;  %v1174_v15 = vld [vmem:[%s1546_s1 + $0x98] sm:$0xff]   ;;  %v1178_v19 = vld [vmem:[%s1546_s1 + $0xa0] sm:$0xff]   ;;  %v1182_v23 = vld [vmem:[%s1546_s1 + $0xa8] sm:$0xff]  }
   0x9   :  { %1054 = vmatpush3.bf16.msra.mxu1 %v1166_v7  ;;  %991 = vmatprep.subr.bf16.mxu0 %v1167_v8  ;;  %v1183_v24 = vld [vmem:[%s1546_s1 + $0x70] sm:$0xff]   ;;  %v1187_v28 = vld [vmem:[%s1546_s1 + $0x78] sm:$0xff]   ;;  %v1196_v35 = vld [vmem:[%s1547_s0 + $0xc] ss:$20 sps:$4 sm:$0xff]  }
   0xa   :  { %1055 = vmatprep.subr.bf16.mxu1 %v1168_v9  ;;  %v1184_v25 = vld [vmem:[%s1546_s1 + $0xf0] sm:$0xff]   ;;  %v1188_v29 = vld [vmem:[%s1546_s1 + $0xf8] sm:$0xff]   ;;  %v1197_v36 = vld [vmem:[%s1546_s1 + $0x100] sm:$0xff]   ;;  %705 = vmatprep.mubr.bf16.mxu1 %v1196_v35 }
   0xb   :  { %v1185_v26 = vld [vmem:[%s1546_s1 + $0x30] sm:$0xff]   ;;  %v1189_v30 = vld [vmem:[%s1546_s1 + $0x38] sm:$0xff]   ;;  %v1198_v37 = vld [vmem:[%s1547_s0 + $0x2c] ss:$20 sps:$4 sm:$0xff]  }
   0xc   :  { %992 = vmatpush3.bf16.msra.mxu0 %v1169_v10  ;;  %v1186_v27 = vld [vmem:[%s1546_s1 + $0xb0] sm:$0xff]   ;;  %v1190_v31 = vld [vmem:[%s1546_s1 + $0xb8] sm:$0xff]   ;;  %v1210_v42 = vld [vmem:[%s1546_s1 + $0x108] sm:$0xff]  }
   0xd   :  { %1056 = vmatpush3.bf16.msra.mxu1 %v1170_v11  ;;  %993 = vmatprep.subr.bf16.mxu0 %v1171_v12  ;;  %v1191_v32 = vld [vmem:[%s1547_s0] ss:$20 sps:$4 sm:$0xff]   ;;  %v1193_v33 = vld [vmem:[%s1547_s0 + $0x4] ss:$20 sps:$4 sm:$0xff]   ;;  %v1194_v34 = vld [vmem:[%s1547_s0 + $0x8] ss:$20 sps:$4 sm:$0xff]  }
   0xe   :  { %1057 = vmatprep.subr.bf16.mxu1 %v1172_v13  ;;  %608 = vmatprep.mubr.bf16.mxu0 %v1193_v33  ;;  %v1200_v38 = vld [vmem:[%s1547_s0 + $0x34] ss:$20 sps:$4 sm:$0xff]   ;;  %v1203_v40 = vld [vmem:[%s1547_s0 + $0x30] ss:$20 sps:$4 sm:$0xff]   ;;  %v1209_v45 = vld [vmem:[%s1547_s0 + $0x58] ss:$20 sps:$4 sm:$0xff]  }
   0xf   :  { %v1202_v39 = vld [vmem:[%s1547_s0 + $0x28] ss:$20 sps:$4 sm:$0xff]   ;;  %v1208_v44 = vld [vmem:[%s1547_s0 + $0x50] ss:$20 sps:$4 sm:$0xff]   ;;  %v1215_v50 = vld [vmem:[%s1547_s0 + $0x78] ss:$20 sps:$4 sm:$0xff]  }
  0x10   :  { %994 = vmatpush3.bf16.msra.mxu0 %v1173_v14  ;;  %v1204_v41 = vld [vmem:[%s1547_s0 + $0x54] ss:$20 sps:$4 sm:$0xff]   ;;  %v1206_v43 = vld [vmem:[%s1547_s0 + $0x5c] ss:$20 sps:$4 sm:$0xff]   ;;  %v1213_v48 = vld [vmem:[%s1547_s0 + $0x84] ss:$20 sps:$4 sm:$0xff]  }
  0x11   :  { %1058 = vmatpush3.bf16.msra.mxu1 %v1174_v15  ;;  %995 = vmatprep.subr.bf16.mxu0 %v1175_v16  ;;  %v1223_v46 = vld [vmem:[%s1546_s1 + $0x110] sm:$0xff]   ;;  %v1236_v49 = vld [vmem:[%s1546_s1 + $0x118] sm:$0xff]   ;;  %v1219_v53 = vld [vmem:[%s1547_s0 + $0xac] ss:$20 sps:$4 sm:$0xff]  }
  0x12   :  { %1059 = vmatprep.subr.bf16.mxu1 %v1176_v17  ;;  %v1211_v47 = vld [vmem:[%s1547_s0 + $0x7c] ss:$20 sps:$4 sm:$0xff]   ;;  %v1216_v51 = vld [vmem:[%s1547_s0 + $0x80] ss:$20 sps:$4 sm:$0xff]   ;;  %v1217_v52 = vld [vmem:[%s1547_s0 + $0xa4] ss:$20 sps:$4 sm:$0xff]  }
  0x13   :  { %v1221_v54 = vld [vmem:[%s1547_s0 + $0xa0] ss:$20 sps:$4 sm:$0xff]   ;;  %v1222_v55 = vld [vmem:[%s1547_s0 + $0xa8] ss:$20 sps:$4 sm:$0xff]   ;;  %v1229_v59 = vld [vmem:[%s1547_s0 + $0xd0] ss:$20 sps:$4 sm:$0xff]  }
  0x14   :  { %996 = vmatpush3.bf16.msra.mxu0 %v1177_v18  ;;  %v1224_v56 = vld [vmem:[%s1547_s0 + $0xcc] ss:$20 sps:$4 sm:$0xff]   ;;  %v1226_v57 = vld [vmem:[%s1547_s0 + $0xd4] ss:$20 sps:$4 sm:$0xff]   ;;  %v1232_v61 = vld [vmem:[%s1547_s0 + $0xfc] ss:$20 sps:$4 sm:$0xff]  }
  0x15   :  { %1060 = vmatpush3.bf16.msra.mxu1 %v1178_v19  ;;  %997 = vmatprep.subr.bf16.mxu0 %v1179_v20  ;;  %v1228_v58 = vld [vmem:[%s1547_s0 + $0xc8] ss:$20 sps:$4 sm:$0xff]   ;;  %v1234_v62 = vld [vmem:[%s1547_s0 + $0xf0] ss:$20 sps:$4 sm:$0xff]   ;;  %v1235_v63 = vld [vmem:[%s1547_s0 + $0xf8] ss:$20 sps:$4 sm:$0xff]  }
  0x16   :  { %1061 = vmatprep.subr.bf16.mxu1 %v1180_v21  ;;  %v1230_v60 = vld [vmem:[%s1547_s0 + $0xf4] ss:$20 sps:$4 sm:$0xff]   ;;  %v1237_v0 = vld [vmem:[%s1547_s0 + $0x11c] ss:$20 sps:$4 sm:$0xff]   ;;  %v1239_v1 = vld [vmem:[%s1547_s0 + $0x124] ss:$20 sps:$4 sm:$0xff]  }
  0x17   :  { %v1241_v2 = vld [vmem:[%s1547_s0 + $0x118] ss:$20 sps:$4 sm:$0xff]   ;;  %v1242_v3 = vld [vmem:[%s1547_s0 + $0x120] ss:$20 sps:$4 sm:$0xff]   ;;  %v1243_v4 = vld [vmem:[%s1547_s0 + $0x10] ss:$20 sps:$4 sm:$0xff]  }
  0x18   :  { %998 = vmatpush3.bf16.msra.mxu0 %v1181_v22  ;;  %v1244_v5 = vld [vmem:[%s1547_s0 + $0xb0] ss:$20 sps:$4 sm:$0xff]   ;;  %v1245_v6 = vld [vmem:[%s1547_s0 + $0x38] ss:$20 sps:$4 sm:$0xff]   ;;  %v1247_v8 = vld [vmem:[%s1547_s0 + $0x60] ss:$20 sps:$4 sm:$0xff]  }
  0x19   :  { %1062 = vmatpush3.bf16.msra.mxu1 %v1182_v23  ;;  %999 = vmatprep.subr.bf16.mxu0 %v1183_v24  ;;  %v1246_v7 = vld [vmem:[%s1547_s0 + $0xd8] ss:$20 sps:$4 sm:$0xff]   ;;  %v1248_v9 = vld [vmem:[%s1547_s0 + $0x100] ss:$20 sps:$4 sm:$0xff]   ;;  %v1249_v10 = vld [vmem:[%s1547_s0 + $0x88] ss:$20 sps:$4 sm:$0xff]  }
  0x1a   :  { %1063 = vmatprep.subr.bf16.mxu1 %v1184_v25  ;;  %v1250_v11 = vld [vmem:[%s1547_s0 + $0x128] ss:$20 sps:$4 sm:$0xff]  }
  0x1c   :  { %1000 = vmatpush3.bf16.msra.mxu0 %v1185_v26 }
  0x1d   :  { %1064 = vmatpush3.bf16.msra.mxu1 %v1186_v27  ;;  %1001 = vmatprep.subr.bf16.mxu0 %v1187_v28 }
  0x1e   :  { %1065 = vmatprep.subr.bf16.mxu1 %v1188_v29 }
  0x20   :  { %1002 = vmatpush3.bf16.msra.mxu0 %v1189_v30 }
  0x21   :  { %1066 = vmatpush3.bf16.msra.mxu1 %v1190_v31  ;;  %1127 = vmatprep.subr.bf16.mxu0 %v1197_v36 }
  0x22   :  { %1151 = vmatprep.subr.bf16.mxu1 %v1197_v36 }
  0x23   :  { %609 = vmatmul.mubr.bf16.vlgmr.msra.gmra.mrb[0].mxu0 %v1191_v32 }
  0x24   :  { %706 = vmatmul.mubr.bf16.vlgmr.msra.gmra.mrb[0].mxu1 %v1194_v34  ;;  %1128 = vmatpush3.bf16.msra.mxu0 %v1197_v36 }
  0x25   :  { %1155 = vmatpush3.bf16.msra.mxu1 %v1197_v36  ;;  %616 = vmatprep.mubr.bf16.mxu0 %v1198_v37 }
  0x26   :  { %713 = vmatprep.mubr.bf16.mxu1 %v1200_v38  ;;  %1129 = vmatprep.subr.bf16.mxu0 %v1210_v42 }
  0x27   :  { %1152 = vmatprep.subr.bf16.mxu1 %v1210_v42 }
  0x28   :  { %1130 = vmatpush3.bf16.msra.mxu0 %v1210_v42 }
  0x29   :  { %1156 = vmatpush3.bf16.msra.mxu1 %v1210_v42  ;;  %1131 = vmatprep.subr.bf16.mxu0 %v1223_v46 }
  0x2a   :  { %1153 = vmatprep.subr.bf16.mxu1 %v1223_v46 }
  0x2b   :  { %617 = vmatmul.mubr.bf16.gmra.mrb[4].mxu0 %v1202_v39 }
  0x2c   :  { %714 = vmatmul.mubr.bf16.gmra.mrb[4].mxu1 %v1203_v40  ;;  %624 = vmatprep.mubr.bf16.mxu0 %v1204_v41 }
  0x2d   :  { %721 = vmatprep.mubr.bf16.mxu1 %v1206_v43  ;;  %1132 = vmatpush3.bf16.msra.mxu0 %v1223_v46 }
  0x2e   :  { %1157 = vmatpush3.bf16.msra.mxu1 %v1223_v46  ;;  %1133 = vmatprep.subr.bf16.mxu0 %v1236_v49 }
  0x2f   :  { %1154 = vmatprep.subr.bf16.mxu1 %v1236_v49 }
  0x31   :  { %1134 = vmatpush3.bf16.msra.mxu0 %v1236_v49 }
  0x32   :  { %1158 = vmatpush3.bf16.msra.mxu1 %v1236_v49 }
  0x33   :  { %625 = vmatmul.mubr.bf16.gmra.mrb[8].mxu0 %v1208_v44 }
  0x34   :  { %722 = vmatmul.mubr.bf16.gmra.mrb[8].mxu1 %v1209_v45  ;;  %632 = vmatprep.mubr.bf16.mxu0 %v1211_v47 }
  0x35   :  { %729 = vmatprep.mubr.bf16.mxu1 %v1213_v48 }
  0x3b   :  { %633 = vmatmul.mubr.bf16.gmra.mrb[12].mxu0 %v1215_v50 }
  0x3c   :  { %730 = vmatmul.mubr.bf16.gmra.mrb[12].mxu1 %v1216_v51  ;;  %640 = vmatprep.mubr.bf16.mxu0 %v1217_v52 }
  0x3d   :  { %737 = vmatprep.mubr.bf16.mxu1 %v1219_v53 }
  0x43   :  { %641 = vmatmul.mubr.bf16.gmra.mrb[16].mxu0 %v1221_v54 }
  0x44   :  { %738 = vmatmul.mubr.bf16.gmra.mrb[16].mxu1 %v1222_v55  ;;  %648 = vmatprep.mubr.bf16.mxu0 %v1224_v56 }
  0x45   :  { %745 = vmatprep.mubr.bf16.mxu1 %v1226_v57 }
  0x4b   :  { %649 = vmatmul.mubr.bf16.gmra.mrb[20].mxu0 %v1228_v58 }
  0x4c   :  { %746 = vmatmul.mubr.bf16.gmra.mrb[20].mxu1 %v1229_v59  ;;  %656 = vmatprep.mubr.bf16.mxu0 %v1230_v60 }
  0x4d   :  { %753 = vmatprep.mubr.bf16.mxu1 %v1232_v61 }
  0x53   :  { %657 = vmatmul.mubr.bf16.gmra.mrb[24].mxu0 %v1234_v62 }
  0x54   :  { %754 = vmatmul.mubr.bf16.gmra.mrb[24].mxu1 %v1235_v63  ;;  %664 = vmatprep.mubr.bf16.mxu0 %v1237_v0 }
  0x55   :  { %761 = vmatprep.mubr.bf16.mxu1 %v1239_v1 }
  0x5b   :  { %665 = vmatmul.mubr.bf16.gmra.mrb[28].mxu0 %v1241_v2 }
  0x5c   :  { %762 = vmatmul.mubr.bf16.gmra.mrb[28].mxu1 %v1242_v3  ;;  %1135 = vmatprep.mubr.msk.bf16.mxu0 %vm551_vm0, %v1243_v4 }
  0x5d   :  { %1143 = vmatprep.mubr.msk.bf16.mxu1 %vm551_vm0, %v1244_v5 }
  0x63   :  { %1136 = vmatmul.mubr.msk.bf16.vlgmr.msra.gmra.mrb[32].mxu0 %vm551_vm0, %v1245_v6 }
  0x64   :  { %1144 = vmatmul.mubr.msk.bf16.vlgmr.msra.gmra.mrb[32].mxu1 %vm551_vm0, %v1246_v7  ;;  %1139 = vmatprep.mubr.msk.bf16.mxu0 %vm551_vm0, %v1247_v8 }
  0x65   :  { %1147 = vmatprep.mubr.msk.bf16.mxu1 %vm551_vm0, %v1248_v9 }
  0x6b   :  { %1140 = vmatmul.mubr.msk.bf16.gmra.mrb[36].mxu0 %vm551_vm0, %v1249_v10 }
  0x6c   :  { %1148 = vmatmul.mubr.msk.bf16.gmra.mrb[36].mxu1 %vm551_vm0, %v1250_v11 }
  0xf6   :  { %v1003_v12 = vpop.f32.mrb[0].mxu0 }
  0xf7   :  { %v1067_v13 = vpop.f32.mrb[0].mxu1  ;;  %v1004_v14 = vpop.f32.mrb[1].mxu0 }
  0xf8   :  { %v1005_v15 = vadd.f32 %v1004_v14, %v1003_v12  ;;  %v1068_v16 = vpop.f32.mrb[1].mxu1  ;;  %v1006_v17 = vpop.f32.mrb[2].mxu0 }
  0xf9   :  { %v1069_v18 = vadd.f32 %v1068_v16, %v1067_v13  ;;  %v1070_v19 = vpop.f32.mrb[2].mxu1  ;;  %v1007_v20 = vpop.f32.mrb[3].mxu0 }
  0xfa   :  { %v1008_v21 = vadd.f32 %v1007_v20, %v1006_v17  ;;  %v1071_v22 = vpop.f32.mrb[3].mxu1 }
  0xfb   :  { %v1072_v23 = vadd.f32 %v1071_v22, %v1070_v19  ;;  %v1507_v24 = vadd.f32 %v1069_v18, %v1005_v15 }
  0xfd   :  { %v1509_v25 = vadd.f32 %v1072_v23, %v1008_v21 }
  0xfe   :  { %v1009_v26 = vpop.f32.mrb[4].mxu0 }
  0xff   :  { %v1073_v27 = vpop.f32.mrb[4].mxu1  ;;  %v1010_v28 = vpop.f32.mrb[5].mxu0 }
 0x100   :  { %v1011_v29 = vadd.f32 %v1010_v28, %v1009_v26  ;;  %v1074_v30 = vpop.f32.mrb[5].mxu1  ;;  %v1012_v31 = vpop.f32.mrb[6].mxu0 }
 0x101   :  { %v1075_v32 = vadd.f32 %v1074_v30, %v1073_v27  ;;  %v1076_v33 = vpop.f32.mrb[6].mxu1  ;;  %v1013_v34 = vpop.f32.mrb[7].mxu0 }
 0x102   :  { %v1014_v35 = vadd.f32 %v1013_v34, %v1012_v31  ;;  %v1077_v36 = vpop.f32.mrb[7].mxu1 }
 0x103   :  { %v1078_v37 = vadd.f32 %v1077_v36, %v1076_v33  ;;  %v1511_v38 = vadd.f32 %v1075_v32, %v1011_v29 }
 0x105   :  { %v1513_v39 = vadd.f32 %v1078_v37, %v1014_v35 }
 0x106   :  { %v1015_v40 = vpop.f32.mrb[8].mxu0 }
 0x107   :  { %v1079_v41 = vpop.f32.mrb[8].mxu1  ;;  %v1016_v42 = vpop.f32.mrb[9].mxu0 }
 0x108   :  { %v1017_v43 = vadd.f32 %v1016_v42, %v1015_v40  ;;  %v1080_v44 = vpop.f32.mrb[9].mxu1  ;;  %v1018_v45 = vpop.f32.mrb[10].mxu0 }
 0x109   :  { %v1081_v46 = vadd.f32 %v1080_v44, %v1079_v41  ;;  %v1082_v47 = vpop.f32.mrb[10].mxu1  ;;  %v1019_v48 = vpop.f32.mrb[11].mxu0 }
 0x10a   :  { %v1020_v49 = vadd.f32 %v1019_v48, %v1018_v45  ;;  %v1083_v50 = vpop.f32.mrb[11].mxu1 }
 0x10b   :  { %v1084_v51 = vadd.f32 %v1083_v50, %v1082_v47  ;;  %v1515_v52 = vadd.f32 %v1081_v46, %v1017_v43 }
 0x10d   :  { %v1517_v53 = vadd.f32 %v1084_v51, %v1020_v49 }
 0x10e   :  { %v1021_v54 = vpop.f32.mrb[12].mxu0 }
 0x10f   :  { %v1085_v55 = vpop.f32.mrb[12].mxu1  ;;  %v1022_v56 = vpop.f32.mrb[13].mxu0 }
 0x110   :  { %v1023_v57 = vadd.f32 %v1022_v56, %v1021_v54  ;;  %v1086_v58 = vpop.f32.mrb[13].mxu1  ;;  %v1024_v59 = vpop.f32.mrb[14].mxu0 }
 0x111   :  { %v1087_v60 = vadd.f32 %v1086_v58, %v1085_v55  ;;  %v1088_v61 = vpop.f32.mrb[14].mxu1  ;;  %v1025_v62 = vpop.f32.mrb[15].mxu0 }
 0x112   :  { %v1026_v63 = vadd.f32 %v1025_v62, %v1024_v59  ;;  %v1089_v0 = vpop.f32.mrb[15].mxu1 }
 0x113   :  { %v1090_v1 = vadd.f32 %v1089_v0, %v1088_v61  ;;  %v1519_v2 = vadd.f32 %v1087_v60, %v1023_v57 }
 0x115   :  { %v1521_v3 = vadd.f32 %v1090_v1, %v1026_v63 }
 0x116   :  { %v1027_v4 = vpop.f32.mrb[16].mxu0 }
 0x117   :  { %v1091_v5 = vpop.f32.mrb[16].mxu1  ;;  %v1028_v6 = vpop.f32.mrb[17].mxu0 }
 0x118   :  { %v1029_v7 = vadd.f32 %v1028_v6, %v1027_v4  ;;  %v1092_v8 = vpop.f32.mrb[17].mxu1  ;;  %v1030_v9 = vpop.f32.mrb[18].mxu0 }
 0x119   :  { %v1093_v10 = vadd.f32 %v1092_v8, %v1091_v5  ;;  %v1094_v11 = vpop.f32.mrb[18].mxu1  ;;  %v1031_v12 = vpop.f32.mrb[19].mxu0 }
 0x11a   :  { %v1032_v13 = vadd.f32 %v1031_v12, %v1030_v9  ;;  %v1095_v14 = vpop.f32.mrb[19].mxu1 }
 0x11b   :  { %v1096_v15 = vadd.f32 %v1095_v14, %v1094_v11  ;;  %v740_v16 = vadd.f32 %v1093_v10, %v1029_v7 }
 0x11d   :  { %v743_v17 = vadd.f32 %v1096_v15, %v1032_v13 }
 0x11e   :  { %v1033_v18 = vpop.f32.mrb[20].mxu0 }
 0x11f   :  { %v1097_v19 = vpop.f32.mrb[20].mxu1  ;;  %v1034_v20 = vpop.f32.mrb[21].mxu0 }
 0x120   :  { %v1035_v21 = vadd.f32 %v1034_v20, %v1033_v18  ;;  %v1098_v22 = vpop.f32.mrb[21].mxu1  ;;  %v1036_v23 = vpop.f32.mrb[22].mxu0 }
 0x121   :  { %v1099_v26 = vadd.f32 %v1098_v22, %v1097_v19  ;;  %v1100_v27 = vpop.f32.mrb[22].mxu1  ;;  %v1037_v28 = vpop.f32.mrb[23].mxu0 }
 0x122   :  { %v1038_v29 = vadd.f32 %v1037_v28, %v1036_v23  ;;  %v1101_v30 = vpop.f32.mrb[23].mxu1 }
 0x123   :  { %v1102_v31 = vadd.f32 %v1101_v30, %v1100_v27  ;;  %v748_v32 = vadd.f32 %v1099_v26, %v1035_v21 }
 0x125   :  { %v751_v33 = vadd.f32 %v1102_v31, %v1038_v29 }
 0x126   :  { %v1039_v34 = vpop.f32.mrb[24].mxu0 }
 0x127   :  { %v1103_v35 = vpop.f32.mrb[24].mxu1  ;;  %v1040_v36 = vpop.f32.mrb[25].mxu0 }
 0x128   :  { %v1041_v37 = vadd.f32 %v1040_v36, %v1039_v34  ;;  %v1104_v40 = vpop.f32.mrb[25].mxu1  ;;  %v1042_v41 = vpop.f32.mrb[26].mxu0 }
 0x129   :  { %v1105_v42 = vadd.f32 %v1104_v40, %v1103_v35  ;;  %v1106_v43 = vpop.f32.mrb[26].mxu1  ;;  %v1043_v44 = vpop.f32.mrb[27].mxu0 }
 0x12a   :  { %v1044_v45 = vadd.f32 %v1043_v44, %v1042_v41  ;;  %v1107_v46 = vpop.f32.mrb[27].mxu1 }
 0x12b   :  { %v1108_v47 = vadd.f32 %v1107_v46, %v1106_v43  ;;  %v756_v48 = vadd.f32 %v1105_v42, %v1041_v37 }
 0x12d   :  { %v759_v49 = vadd.f32 %v1108_v47, %v1044_v45 }
 0x12e   :  { %v1045_v50 = vpop.f32.mrb[28].mxu0 }
 0x12f   :  { %v1109_v51 = vpop.f32.mrb[28].mxu1  ;;  %v1046_v54 = vpop.f32.mrb[29].mxu0 }
 0x130   :  { %v1047_v55 = vadd.f32 %v1046_v54, %v1045_v50  ;;  %v1110_v56 = vpop.f32.mrb[29].mxu1  ;;  %v1048_v57 = vpop.f32.mrb[30].mxu0 }
 0x131   :  { %v1111_v58 = vadd.f32 %v1110_v56, %v1109_v51  ;;  %v1112_v59 = vpop.f32.mrb[30].mxu1  ;;  %v1049_v60 = vpop.f32.mrb[31].mxu0 }
 0x132   :  { %v1050_v61 = vadd.f32 %v1049_v60, %v1048_v57  ;;  %v1113_v62 = vpop.f32.mrb[31].mxu1 }
 0x133   :  { %v1114_v63 = vadd.f32 %v1113_v62, %v1112_v59  ;;  %v764_v0 = vadd.f32 %v1111_v58, %v1047_v55 }
 0x135   :  { %v767_v1 = vadd.f32 %v1114_v63, %v1050_v61 }
 0x136   :  { %v1137_v4 = vpop.f32.mrb[32].mxu0 }
 0x137   :  { %v813_v5 = vadd.f32 %v1137_v4, %v1511_v38  ;;  %v1145_v6 = vpop.f32.mrb[32].mxu1  ;;  %v804_v7 = vpop.f32.mrb[33].mxu0 }
 0x138   :  { %v845_v8 = vadd.f32 %v1145_v6, %v748_v32  ;;  %v805_v9 = vadd.f32 %v804_v7, %v1507_v24  ;;  %v836_v10 = vpop.f32.mrb[33].mxu1  ;;  %v1138_v11 = vpop.f32.mrb[34].mxu0 }
 0x139   :  { %v837_v12 = vadd.f32 %v836_v10, %v740_v16  ;;  %v816_v13 = vadd.f32 %v1138_v11, %v1513_v39  ;;  %v1146_v14 = vpop.f32.mrb[34].mxu1  ;;  %v807_v15 = vpop.f32.mrb[35].mxu0 }
 0x13a   :  { %v848_v18 = vadd.f32 %v1146_v14, %v751_v33  ;;  %v808_v19 = vadd.f32 %v807_v15, %v1509_v25  ;;  %v839_v20 = vpop.f32.mrb[35].mxu1 }
 0x13b   :  { %v840_v21 = vadd.f32 %v839_v20, %v743_v17 }
 0x13e   :  { %v1141_v22 = vpop.f32.mrb[36].mxu0 }
 0x13f   :  { %v829_v38 = vadd.f32 %v1141_v22, %v1519_v2  ;;  %v1149_v23 = vpop.f32.mrb[36].mxu1  ;;  %v820_v26 = vpop.f32.mrb[37].mxu0 }
 0x140   :  { %v861_v27 = vadd.f32 %v1149_v23, %v764_v0  ;;  %v821_v24 = vadd.f32 %v820_v26, %v1515_v52  ;;  %v852_v28 = vpop.f32.mrb[37].mxu1  ;;  %v1142_v29 = vpop.f32.mrb[38].mxu0  ;;  %v986_v52 = vld [vmem:[%s1548_s2] ss:$0 sm:$0xff] }
 0x141   :  { %v873_v16 = vmax.f32 %v813_v5, %v829_v38  ;;  %v853_v30 = vadd.f32 %v852_v28, %v756_v48  ;;  %v832_v39 = vadd.f32 %v1142_v29, %v1521_v3  ;;  %v1150_v31 = vpop.f32.mrb[38].mxu1  ;;  %v823_v32 = vpop.f32.mrb[39].mxu0 }
 0x142   :  { %v867_v33 = vmax.f32 %v805_v9, %v821_v24  ;;  %v864_v25 = vadd.f32 %v1150_v31, %v767_v1  ;;  %v824_v17 = vadd.f32 %v823_v32, %v1517_v53  ;;  %v855_v34 = vpop.f32.mrb[39].mxu1 }
 0x143   :  { %v874_v35 = vmax.f32 %v873_v16, %v845_v8  ;;  %v876_v2 = vmax.f32 %v816_v13, %v832_v39  ;;  %v856_v36 = vadd.f32 %v855_v34, %v759_v49 }
 0x144   :  { %v868_v37 = vmax.f32 %v867_v33, %v837_v12  ;;  %v870_v40 = vmax.f32 %v808_v19, %v824_v17 }
 0x145   :  { %v875_v41 = vmax.f32 %v874_v35, %v861_v27  ;;  %v877_v42 = vmax.f32 %v876_v2, %v848_v18 }
 0x146   :  { %v869_v43 = vmax.f32 %v868_v37, %v853_v30  ;;  %v871_v3 = vmax.f32 %v870_v40, %v840_v21 }
 0x147   :  { %v888_v44 = vadd.f32 %v986_v52, %v875_v41  ;;  %v878_v45 = vmax.f32 %v877_v42, %v864_v25 }
 0x148   :  { %v886_v46 = vadd.f32 %v986_v52, %v869_v43  ;;  %v872_v47 = vmax.f32 %v871_v3, %v856_v36 }
 0x149   :  { %v892_v48 = vmax.f32 %v888_v44, 0.0  ;;  %v889_v53 = vadd.f32 %v986_v52, %v878_v45 }
 0x14a   :  { %v890_v50 = vmax.f32 %v886_v46, 0.0  ;;  %v887_v51 = vadd.f32 %v986_v52, %v872_v47 }
 0x14b   :  { %896 = vst [vmem:[%s1549_s3 + $0x10] sm:$0xff] %v892_v48  ;;  %v893_v49 = vmax.f32 %v889_v53, 0.0 }
 0x14c   :  { %894 = vst [vmem:[%s1549_s3] sm:$0xff] %v890_v50  ;;  %v891_v54 = vmax.f32 %v887_v51, 0.0 }
 0x14d   :  { %897 = vst [vmem:[%s1549_s3 + $0x18] sm:$0xff] %v893_v49 }
 0x14e   :  { %895 = vst [vmem:[%s1549_s3 + $0x8] sm:$0xff] %v891_v54 }

// kernel: forward.6
= control target key start
LH: loop header
LB: loop body
LE: loop exit
PB: predicated region body
PF: predicated region fallthrough
CT: control target
= control target key end

     0   :  { %s2253_s1 = inlined_call_operand.vmem [shape: bf16[1152,256], index: 1, kind: input, shape index: {}]   ;;  %s2254_s0 = inlined_call_operand.vmem [shape: bf16[4,8,1152], index: 0, kind: input, shape index: {}]   ;;  %s2255_s2 = inlined_call_operand.vmem [shape: f32[1,256], index: 2, kind: input, shape index: {}]   ;;  %s2256_s3 = inlined_call_operand.vmem [shape: f32[8,256], index: 3, kind: output, shape index: {}]  }
   0x1   :  { %v1495_v0 = vld [vmem:[%s2253_s1 + $0x4] ss:$8 sps:$4 sm:$0xff]   ;;  %v1499_v2 = vld [vmem:[%s2253_s1] ss:$8 sps:$4 sm:$0xff]   ;;  %v1501_v4 = vld [vmem:[%s2253_s1 + $0x14] ss:$8 sps:$4 sm:$0xff]  }
   0x2   :  { %v1497_v1 = vld [vmem:[%s2253_s1 + $0x204] ss:$8 sps:$4 sm:$0xff]   ;;  %991 = vmatprep.subr.bf16.mxu1 %v1495_v0  ;;  %v1500_v3 = vld [vmem:[%s2253_s1 + $0x200] ss:$8 sps:$4 sm:$0xff]   ;;  %v1503_v5 = vld [vmem:[%s2253_s1 + $0x214] ss:$8 sps:$4 sm:$0xff]  }
   0x3   :  { %1097 = vmatprep.subr.bf16.mxu0 %v1497_v1  ;;  %992 = vmatpush1.bf16.msra.mxu1 %v1499_v2  ;;  %v1505_v6 = vld [vmem:[%s2253_s1 + $0x10] ss:$8 sps:$4 sm:$0xff]   ;;  %v1507_v8 = vld [vmem:[%s2253_s1 + $0x24] ss:$8 sps:$4 sm:$0xff]   ;;  %v1511_v10 = vld [vmem:[%s2253_s1 + $0x20] ss:$8 sps:$4 sm:$0xff]  }
   0x4   :  { %1098 = vmatpush1.bf16.msra.mxu0 %v1500_v3  ;;  %993 = vmatprep.subr.bf16.mxu1 %v1501_v4  ;;  %v1506_v7 = vld [vmem:[%s2253_s1 + $0x210] ss:$8 sps:$4 sm:$0xff]   ;;  %v1509_v9 = vld [vmem:[%s2253_s1 + $0x224] ss:$8 sps:$4 sm:$0xff]   ;;  %v1512_v11 = vld [vmem:[%s2253_s1 + $0x220] ss:$8 sps:$4 sm:$0xff]  }
   0x5   :  { %1099 = vmatprep.subr.bf16.mxu0 %v1503_v5  ;;  %v1513_v12 = vld [vmem:[%s2253_s1 + $0x34] ss:$8 sps:$4 sm:$0xff]   ;;  %v1517_v14 = vld [vmem:[%s2253_s1 + $0x30] ss:$8 sps:$4 sm:$0xff]   ;;  %v1519_v16 = vld [vmem:[%s2253_s1 + $0x44] ss:$8 sps:$4 sm:$0xff]  }
   0x6   :  { %v1515_v13 = vld [vmem:[%s2253_s1 + $0x234] ss:$8 sps:$4 sm:$0xff]   ;;  %v1518_v15 = vld [vmem:[%s2253_s1 + $0x230] ss:$8 sps:$4 sm:$0xff]   ;;  %v1521_v17 = vld [vmem:[%s2253_s1 + $0x244] ss:$8 sps:$4 sm:$0xff]  }
   0x7   :  { %994 = vmatpush1.bf16.msra.mxu1 %v1505_v6  ;;  %v1523_v18 = vld [vmem:[%s2253_s1 + $0x40] ss:$8 sps:$4 sm:$0xff]   ;;  %v1525_v20 = vld [vmem:[%s2253_s1 + $0x54] ss:$8 sps:$4 sm:$0xff]   ;;  %v1529_v22 = vld [vmem:[%s2253_s1 + $0x50] ss:$8 sps:$4 sm:$0xff]  }
   0x8   :  { %1100 = vmatpush1.bf16.msra.mxu0 %v1506_v7  ;;  %995 = vmatprep.subr.bf16.mxu1 %v1507_v8  ;;  %v1524_v19 = vld [vmem:[%s2253_s1 + $0x240] ss:$8 sps:$4 sm:$0xff]   ;;  %v1527_v21 = vld [vmem:[%s2253_s1 + $0x254] ss:$8 sps:$4 sm:$0xff]   ;;  %v1530_v23 = vld [vmem:[%s2253_s1 + $0x250] ss:$8 sps:$4 sm:$0xff]  }
   0x9   :  { %1101 = vmatprep.subr.bf16.mxu0 %v1509_v9  ;;  %v1531_v24 = vld [vmem:[%s2253_s1 + $0x64] ss:$8 sps:$4 sm:$0xff]   ;;  %v1535_v26 = vld [vmem:[%s2253_s1 + $0x60] ss:$8 sps:$4 sm:$0xff]   ;;  %v1537_v28 = vld [vmem:[%s2253_s1 + $0x74] ss:$8 sps:$4 sm:$0xff]  }
   0xa   :  { %v1533_v25 = vld [vmem:[%s2253_s1 + $0x264] ss:$8 sps:$4 sm:$0xff]   ;;  %v1536_v27 = vld [vmem:[%s2253_s1 + $0x260] ss:$8 sps:$4 sm:$0xff]   ;;  %v1539_v29 = vld [vmem:[%s2253_s1 + $0x274] ss:$8 sps:$4 sm:$0xff]  }
   0xb   :  { %996 = vmatpush1.bf16.msra.mxu1 %v1511_v10  ;;  %v1541_v30 = vld [vmem:[%s2253_s1 + $0x70] ss:$8 sps:$4 sm:$0xff]   ;;  %v1543_v32 = vld [vmem:[%s2253_s1 + $0x84] ss:$8 sps:$4 sm:$0xff]   ;;  %v1547_v34 = vld [vmem:[%s2253_s1 + $0x80] ss:$8 sps:$4 sm:$0xff]  }
   0xc   :  { %1102 = vmatpush1.bf16.msra.mxu0 %v1512_v11  ;;  %997 = vmatprep.subr.bf16.mxu1 %v1513_v12  ;;  %v1542_v31 = vld [vmem:[%s2253_s1 + $0x270] ss:$8 sps:$4 sm:$0xff]   ;;  %v1545_v33 = vld [vmem:[%s2253_s1 + $0x284] ss:$8 sps:$4 sm:$0xff]   ;;  %v1548_v35 = vld [vmem:[%s2253_s1 + $0x280] ss:$8 sps:$4 sm:$0xff]  }
   0xd   :  { %1103 = vmatprep.subr.bf16.mxu0 %v1515_v13  ;;  %v1549_v36 = vld [vmem:[%s2253_s1 + $0x94] ss:$8 sps:$4 sm:$0xff]   ;;  %v1553_v38 = vld [vmem:[%s2253_s1 + $0x90] ss:$8 sps:$4 sm:$0xff]   ;;  %v1555_v40 = vld [vmem:[%s2253_s1 + $0xa4] ss:$8 sps:$4 sm:$0xff]  }
   0xe   :  { %v1551_v37 = vld [vmem:[%s2253_s1 + $0x294] ss:$8 sps:$4 sm:$0xff]   ;;  %v1554_v39 = vld [vmem:[%s2253_s1 + $0x290] ss:$8 sps:$4 sm:$0xff]   ;;  %v1557_v41 = vld [vmem:[%s2253_s1 + $0x2a4] ss:$8 sps:$4 sm:$0xff]  }
   0xf   :  { %998 = vmatpush1.bf16.msra.mxu1 %v1517_v14  ;;  %v1559_v42 = vld [vmem:[%s2253_s1 + $0xa0] ss:$8 sps:$4 sm:$0xff]   ;;  %v1561_v44 = vld [vmem:[%s2253_s1 + $0xb4] ss:$8 sps:$4 sm:$0xff]   ;;  %v1565_v46 = vld [vmem:[%s2253_s1 + $0xb0] ss:$8 sps:$4 sm:$0xff]  }
  0x10   :  { %1104 = vmatpush1.bf16.msra.mxu0 %v1518_v15  ;;  %999 = vmatprep.subr.bf16.mxu1 %v1519_v16  ;;  %v1560_v43 = vld [vmem:[%s2253_s1 + $0x2a0] ss:$8 sps:$4 sm:$0xff]   ;;  %v1563_v45 = vld [vmem:[%s2253_s1 + $0x2b4] ss:$8 sps:$4 sm:$0xff]   ;;  %v1566_v47 = vld [vmem:[%s2253_s1 + $0x2b0] ss:$8 sps:$4 sm:$0xff]  }
  0x11   :  { %1105 = vmatprep.subr.bf16.mxu0 %v1521_v17  ;;  %v1593_v48 = vld [vmem:[%s2254_s0 + $0x4] ss:$36 sps:$4 sm:$0xff]   ;;  %v1599_v51 = vld [vmem:[%s2254_s0 + $0x14] ss:$36 sps:$4 sm:$0xff]  }
  0x12   :  { %v1567_v49 = vld [vmem:[%s2253_s1 + $0xc4] ss:$8 sps:$4 sm:$0xff]   ;;  %1023 = vmatprep.mubr.bf16.mxu1 %v1593_v48  ;;  %v1571_v52 = vld [vmem:[%s2253_s1 + $0xc0] ss:$8 sps:$4 sm:$0xff]   ;;  %v1573_v54 = vld [vmem:[%s2253_s1 + $0xd4] ss:$8 sps:$4 sm:$0xff]   ;;  %1129 = vmatprep.mubr.bf16.mxu0 %v1599_v51 }
  0x13   :  { %1000 = vmatpush1.bf16.msra.mxu1 %v1523_v18  ;;  %v1569_v50 = vld [vmem:[%s2253_s1 + $0x2c4] ss:$8 sps:$4 sm:$0xff]   ;;  %v1572_v53 = vld [vmem:[%s2253_s1 + $0x2c0] ss:$8 sps:$4 sm:$0xff]   ;;  %v1575_v55 = vld [vmem:[%s2253_s1 + $0x2d4] ss:$8 sps:$4 sm:$0xff]  }
  0x14   :  { %1106 = vmatpush1.bf16.msra.mxu0 %v1524_v19  ;;  %1001 = vmatprep.subr.bf16.mxu1 %v1525_v20  ;;  %v1577_v56 = vld [vmem:[%s2253_s1 + $0xd0] ss:$8 sps:$4 sm:$0xff]   ;;  %v1579_v58 = vld [vmem:[%s2253_s1 + $0xe4] ss:$8 sps:$4 sm:$0xff]   ;;  %v1583_v60 = vld [vmem:[%s2253_s1 + $0xe0] ss:$8 sps:$4 sm:$0xff]  }
  0x15   :  { %1107 = vmatprep.subr.bf16.mxu0 %v1527_v21  ;;  %v1578_v57 = vld [vmem:[%s2253_s1 + $0x2d0] ss:$8 sps:$4 sm:$0xff]   ;;  %v1581_v59 = vld [vmem:[%s2253_s1 + $0x2e4] ss:$8 sps:$4 sm:$0xff]   ;;  %v1584_v61 = vld [vmem:[%s2253_s1 + $0x2e0] ss:$8 sps:$4 sm:$0xff]  }
  0x16   :  { %v1585_v62 = vld [vmem:[%s2253_s1 + $0xf4] ss:$8 sps:$4 sm:$0xff]   ;;  %v1589_v0 = vld [vmem:[%s2253_s1 + $0xf0] ss:$8 sps:$4 sm:$0xff]   ;;  %v1596_v2 = vld [vmem:[%s2253_s1 + $0x104] ss:$8 sps:$4 sm:$0xff]  }
  0x17   :  { %1002 = vmatpush1.bf16.msra.mxu1 %v1529_v22  ;;  %v1587_v63 = vld [vmem:[%s2253_s1 + $0x2f4] ss:$8 sps:$4 sm:$0xff]   ;;  %v1590_v1 = vld [vmem:[%s2253_s1 + $0x2f0] ss:$8 sps:$4 sm:$0xff]   ;;  %v1602_v3 = vld [vmem:[%s2253_s1 + $0x304] ss:$8 sps:$4 sm:$0xff]  }
  0x18   :  { %1108 = vmatpush1.bf16.msra.mxu0 %v1530_v23  ;;  %1003 = vmatprep.subr.bf16.mxu1 %v1531_v24  ;;  %v1591_v4 = vld [vmem:[%s2254_s0] ss:$36 sps:$4 sm:$0xff]   ;;  %v1597_v6 = vld [vmem:[%s2254_s0 + $0x10] ss:$36 sps:$4 sm:$0xff]  }
  0x19   :  { %1109 = vmatprep.subr.bf16.mxu0 %v1533_v25  ;;  %v1594_v5 = vld [vmem:[%s2253_s1 + $0x100] ss:$8 sps:$4 sm:$0xff]   ;;  %v1605_v8 = vld [vmem:[%s2253_s1 + $0x114] ss:$8 sps:$4 sm:$0xff]   ;;  %v1603_v10 = vld [vmem:[%s2253_s1 + $0x110] ss:$8 sps:$4 sm:$0xff]  }
  0x1a   :  { %v1600_v7 = vld [vmem:[%s2253_s1 + $0x300] ss:$8 sps:$4 sm:$0xff]   ;;  %v1608_v9 = vld [vmem:[%s2253_s1 + $0x314] ss:$8 sps:$4 sm:$0xff]   ;;  %v1606_v11 = vld [vmem:[%s2253_s1 + $0x310] ss:$8 sps:$4 sm:$0xff]  }
  0x1b   :  { %1004 = vmatpush1.bf16.msra.mxu1 %v1535_v26  ;;  %v1611_v12 = vld [vmem:[%s2253_s1 + $0x124] ss:$8 sps:$4 sm:$0xff]   ;;  %v1609_v14 = vld [vmem:[%s2253_s1 + $0x120] ss:$8 sps:$4 sm:$0xff]   ;;  %v1617_v16 = vld [vmem:[%s2253_s1 + $0x134] ss:$8 sps:$4 sm:$0xff]  }
  0x1c   :  { %1110 = vmatpush1.bf16.msra.mxu0 %v1536_v27  ;;  %1005 = vmatprep.subr.bf16.mxu1 %v1537_v28  ;;  %v1614_v13 = vld [vmem:[%s2253_s1 + $0x324] ss:$8 sps:$4 sm:$0xff]   ;;  %v1612_v15 = vld [vmem:[%s2253_s1 + $0x320] ss:$8 sps:$4 sm:$0xff]   ;;  %v1620_v17 = vld [vmem:[%s2253_s1 + $0x334] ss:$8 sps:$4 sm:$0xff]  }
  0x1d   :  { %1111 = vmatprep.subr.bf16.mxu0 %v1539_v29  ;;  %v1615_v18 = vld [vmem:[%s2253_s1 + $0x130] ss:$8 sps:$4 sm:$0xff]   ;;  %v1623_v20 = vld [vmem:[%s2253_s1 + $0x144] ss:$8 sps:$4 sm:$0xff]   ;;  %v1621_v22 = vld [vmem:[%s2253_s1 + $0x140] ss:$8 sps:$4 sm:$0xff]  }
  0x1e   :  { %v1618_v19 = vld [vmem:[%s2253_s1 + $0x330] ss:$8 sps:$4 sm:$0xff]   ;;  %v1626_v21 = vld [vmem:[%s2253_s1 + $0x344] ss:$8 sps:$4 sm:$0xff]   ;;  %v1624_v23 = vld [vmem:[%s2253_s1 + $0x340] ss:$8 sps:$4 sm:$0xff]  }
  0x1f   :  { %1006 = vmatpush1.bf16.msra.mxu1 %v1541_v30  ;;  %v1629_v24 = vld [vmem:[%s2253_s1 + $0x154] ss:$8 sps:$4 sm:$0xff]   ;;  %v1627_v26 = vld [vmem:[%s2253_s1 + $0x150] ss:$8 sps:$4 sm:$0xff]   ;;  %v1635_v28 = vld [vmem:[%s2253_s1 + $0x164] ss:$8 sps:$4 sm:$0xff]  }
  0x20   :  { %1112 = vmatpush1.bf16.msra.mxu0 %v1542_v31  ;;  %1007 = vmatprep.subr.bf16.mxu1 %v1543_v32  ;;  %v1632_v25 = vld [vmem:[%s2253_s1 + $0x354] ss:$8 sps:$4 sm:$0xff]   ;;  %v1630_v27 = vld [vmem:[%s2253_s1 + $0x350] ss:$8 sps:$4 sm:$0xff]   ;;  %v1685_v31 = vld [vmem:[%s2254_s0 + $0x48] ss:$36 sps:$4 sm:$0xff]  }
  0x21   :  { %1113 = vmatprep.subr.bf16.mxu0 %v1545_v33  ;;  %v1681_v29 = vld [vmem:[%s2254_s0 + $0x4c] ss:$36 sps:$4 sm:$0xff]   ;;  %v1683_v30 = vld [vmem:[%s2254_s0 + $0x5c] ss:$36 sps:$4 sm:$0xff]  }
  0x22   :  { %v1638_v32 = vld [vmem:[%s2253_s1 + $0x364] ss:$8 sps:$4 sm:$0xff]   ;;  %v1689_v33 = vld [vmem:[%s2254_s0 + $0x58] ss:$36 sps:$4 sm:$0xff]  }
  0x23   :  { %1008 = vmatpush1.bf16.msra.mxu1 %v1547_v34  ;;  %v1633_v34 = vld [vmem:[%s2253_s1 + $0x160] ss:$8 sps:$4 sm:$0xff]   ;;  %v1651_v48 = vld [vmem:[%s2253_s1 + $0x190] ss:$8 sps:$4 sm:$0xff]   ;;  %v1662_v51 = vld [vmem:[%s2253_s1 + $0x3a4] ss:$8 sps:$4 sm:$0xff]  }
  0x24   :  { %1114 = vmatpush1.bf16.msra.mxu0 %v1548_v35  ;;  %1009 = vmatprep.subr.bf16.mxu1 %v1549_v36  ;;  %v1636_v35 = vld [vmem:[%s2253_s1 + $0x360] ss:$8 sps:$4 sm:$0xff]   ;;  %v1641_v36 = vld [vmem:[%s2253_s1 + $0x174] ss:$8 sps:$4 sm:$0xff]  }
  0x25   :  { %1115 = vmatprep.subr.bf16.mxu0 %v1551_v37  ;;  %v1644_v37 = vld [vmem:[%s2253_s1 + $0x374] ss:$8 sps:$4 sm:$0xff]  }
  0x27   :  { %1010 = vmatpush1.bf16.msra.mxu1 %v1553_v38  ;;  %v1639_v38 = vld [vmem:[%s2253_s1 + $0x170] ss:$8 sps:$4 sm:$0xff]  }
  0x28   :  { %1116 = vmatpush1.bf16.msra.mxu0 %v1554_v39  ;;  %1011 = vmatprep.subr.bf16.mxu1 %v1555_v40  ;;  %v1642_v39 = vld [vmem:[%s2253_s1 + $0x370] ss:$8 sps:$4 sm:$0xff]   ;;  %v1647_v40 = vld [vmem:[%s2253_s1 + $0x184] ss:$8 sps:$4 sm:$0xff]  }
  0x29   :  { %1117 = vmatprep.subr.bf16.mxu0 %v1557_v41  ;;  %v1701_v41 = vld [vmem:[%s2254_s0 + $0xc] ss:$36 sps:$4 sm:$0xff]  }
  0x2b   :  { %1012 = vmatpush1.bf16.msra.mxu1 %v1559_v42  ;;  %v1650_v42 = vld [vmem:[%s2253_s1 + $0x384] ss:$8 sps:$4 sm:$0xff]  }
  0x2c   :  { %1118 = vmatpush1.bf16.msra.mxu0 %v1560_v43  ;;  %1013 = vmatprep.subr.bf16.mxu1 %v1561_v44  ;;  %v1704_v43 = vld [vmem:[%s2254_s0 + $0x1c] ss:$36 sps:$4 sm:$0xff]  }
  0x2d   :  { %1119 = vmatprep.subr.bf16.mxu0 %v1563_v45  ;;  %v1645_v44 = vld [vmem:[%s2253_s1 + $0x180] ss:$8 sps:$4 sm:$0xff]  }
  0x2e   :  { %v1648_v45 = vld [vmem:[%s2253_s1 + $0x380] ss:$8 sps:$4 sm:$0xff]  }
  0x2f   :  { %1014 = vmatpush1.bf16.msra.mxu1 %v1565_v46  ;;  %v1653_v46 = vld [vmem:[%s2253_s1 + $0x194] ss:$8 sps:$4 sm:$0xff]  }
  0x30   :  { %1120 = vmatpush1.bf16.msra.mxu0 %v1566_v47  ;;  %1015 = vmatprep.subr.bf16.mxu1 %v1567_v49  ;;  %v1656_v47 = vld [vmem:[%s2253_s1 + $0x394] ss:$8 sps:$4 sm:$0xff]   ;;  %v1654_v49 = vld [vmem:[%s2253_s1 + $0x390] ss:$8 sps:$4 sm:$0xff]  }
  0x31   :  { %1121 = vmatprep.subr.bf16.mxu0 %v1569_v50  ;;  %v1659_v50 = vld [vmem:[%s2253_s1 + $0x1a4] ss:$8 sps:$4 sm:$0xff]  }
  0x33   :  { %1016 = vmatpush1.bf16.msra.mxu1 %v1571_v52  ;;  %v1657_v52 = vld [vmem:[%s2253_s1 + $0x1a0] ss:$8 sps:$4 sm:$0xff]  }
  0x34   :  { %1122 = vmatpush1.bf16.msra.mxu0 %v1572_v53  ;;  %1017 = vmatprep.subr.bf16.mxu1 %v1573_v54  ;;  %v1660_v53 = vld [vmem:[%s2253_s1 + $0x3a0] ss:$8 sps:$4 sm:$0xff]   ;;  %v1665_v54 = vld [vmem:[%s2253_s1 + $0x1b4] ss:$8 sps:$4 sm:$0xff]  }
  0x35   :  { %1123 = vmatprep.subr.bf16.mxu0 %v1575_v55  ;;  %v1668_v55 = vld [vmem:[%s2253_s1 + $0x3b4] ss:$8 sps:$4 sm:$0xff]  }
  0x37   :  { %1018 = vmatpush1.bf16.msra.mxu1 %v1577_v56  ;;  %v1663_v56 = vld [vmem:[%s2253_s1 + $0x1b0] ss:$8 sps:$4 sm:$0xff]  }
  0x38   :  { %1124 = vmatpush1.bf16.msra.mxu0 %v1578_v57  ;;  %1019 = vmatprep.subr.bf16.mxu1 %v1579_v58  ;;  %v1666_v57 = vld [vmem:[%s2253_s1 + $0x3b0] ss:$8 sps:$4 sm:$0xff]   ;;  %v1671_v58 = vld [vmem:[%s2253_s1 + $0x1c4] ss:$8 sps:$4 sm:$0xff]  }
  0x39   :  { %1125 = vmatprep.subr.bf16.mxu0 %v1581_v59  ;;  %v1674_v59 = vld [vmem:[%s2253_s1 + $0x3c4] ss:$8 sps:$4 sm:$0xff]  }
  0x3b   :  { %1020 = vmatpush1.bf16.msra.mxu1 %v1583_v60  ;;  %v1669_v60 = vld [vmem:[%s2253_s1 + $0x1c0] ss:$8 sps:$4 sm:$0xff]  }
  0x3c   :  { %1126 = vmatpush1.bf16.msra.mxu0 %v1584_v61  ;;  %1021 = vmatprep.subr.bf16.mxu1 %v1585_v62  ;;  %v1672_v61 = vld [vmem:[%s2253_s1 + $0x3c0] ss:$8 sps:$4 sm:$0xff]   ;;  %v1677_v62 = vld [vmem:[%s2253_s1 + $0x1d4] ss:$8 sps:$4 sm:$0xff]  }
  0x3d   :  { %1127 = vmatprep.subr.bf16.mxu0 %v1587_v63  ;;  %v1680_v63 = vld [vmem:[%s2253_s1 + $0x3d4] ss:$8 sps:$4 sm:$0xff]  }
  0x3f   :  { %1022 = vmatpush1.bf16.msra.mxu1 %v1589_v0  ;;  %v1675_v0 = vld [vmem:[%s2253_s1 + $0x1d0] ss:$8 sps:$4 sm:$0xff]  }
  0x40   :  { %1128 = vmatpush1.bf16.msra.mxu0 %v1590_v1  ;;  %1044 = vmatprep.subr.bf16.mxu1 %v1596_v2  ;;  %v1678_v1 = vld [vmem:[%s2253_s1 + $0x3d0] ss:$8 sps:$4 sm:$0xff]   ;;  %v1688_v2 = vld [vmem:[%s2253_s1 + $0x1e4] ss:$8 sps:$4 sm:$0xff]  }
  0x41   :  { %1150 = vmatprep.subr.bf16.mxu0 %v1602_v3  ;;  %v1692_v3 = vld [vmem:[%s2253_s1 + $0x3e4] ss:$8 sps:$4 sm:$0xff]  }
  0x42   :  { %1024 = vmatmul.mubr.bf16.vlgmr.msra.gmra.mrb[0].mxu1 %v1591_v4  ;;  %v1686_v4 = vld [vmem:[%s2253_s1 + $0x1e0] ss:$8 sps:$4 sm:$0xff]  }
  0x43   :  { %1130 = vmatmul.mubr.bf16.vlgmr.msra.gmra.mrb[0].mxu0 %v1597_v6  ;;  %1045 = vmatpush1.bf16.msra.mxu1 %v1594_v5  ;;  %v1690_v5 = vld [vmem:[%s2253_s1 + $0x3e0] ss:$8 sps:$4 sm:$0xff]   ;;  %v1695_v6 = vld [vmem:[%s2253_s1 + $0x1f4] ss:$8 sps:$4 sm:$0xff]  }
  0x44   :  { %1151 = vmatpush1.bf16.msra.mxu0 %v1600_v7  ;;  %1046 = vmatprep.subr.bf16.mxu1 %v1605_v8  ;;  %v1698_v7 = vld [vmem:[%s2253_s1 + $0x3f4] ss:$8 sps:$4 sm:$0xff]   ;;  %v1693_v8 = vld [vmem:[%s2253_s1 + $0x1f0] ss:$8 sps:$4 sm:$0xff]  }
  0x45   :  { %1152 = vmatprep.subr.bf16.mxu0 %v1608_v9  ;;  %1033 = vmatprep.mubr.bf16.mxu1 %v1681_v29  ;;  %v1696_v9 = vld [vmem:[%s2253_s1 + $0x3f0] ss:$8 sps:$4 sm:$0xff]   ;;  %v1731_v29 = vld [vmem:[%s2253_s1 + $0x464] ss:$8 sps:$4 sm:$0xff]  }
  0x46   :  { %1139 = vmatprep.mubr.bf16.mxu0 %v1683_v30  ;;  %v1729_v30 = vld [vmem:[%s2253_s1 + $0x460] ss:$8 sps:$4 sm:$0xff]  }
  0x47   :  { %1047 = vmatpush1.bf16.msra.mxu1 %v1603_v10  ;;  %v1707_v10 = vld [vmem:[%s2253_s1 + $0x404] ss:$8 sps:$4 sm:$0xff]  }
  0x48   :  { %1153 = vmatpush1.bf16.msra.mxu0 %v1606_v11  ;;  %1048 = vmatprep.subr.bf16.mxu1 %v1611_v12  ;;  %v1699_v11 = vld [vmem:[%s2254_s0 + $0x8] ss:$36 sps:$4 sm:$0xff]   ;;  %v1702_v12 = vld [vmem:[%s2254_s0 + $0x18] ss:$36 sps:$4 sm:$0xff]  }
  0x49   :  { %1154 = vmatprep.subr.bf16.mxu0 %v1614_v13  ;;  %v1705_v13 = vld [vmem:[%s2253_s1 + $0x400] ss:$8 sps:$4 sm:$0xff]  }
  0x4a   :  { %1034 = vmatmul.mubr.bf16.gmra.mrb[4].mxu1 %v1685_v31  ;;  %v1734_v31 = vld [vmem:[%s2253_s1 + $0x474] ss:$8 sps:$4 sm:$0xff]  }
  0x4b   :  { %1049 = vmatpush1.bf16.msra.mxu1 %v1609_v14  ;;  %1140 = vmatmul.mubr.bf16.gmra.mrb[4].mxu0 %v1689_v33  ;;  %v1710_v14 = vld [vmem:[%s2253_s1 + $0x414] ss:$8 sps:$4 sm:$0xff]   ;;  %v1735_v33 = vld [vmem:[%s2254_s0 + $0x20] ss:$36 sps:$4 sm:$0xff]  }
  0x4c   :  { %1155 = vmatpush1.bf16.msra.mxu0 %v1612_v15  ;;  %1050 = vmatprep.subr.bf16.mxu1 %v1617_v16  ;;  %v1711_v15 = vld [vmem:[%s2254_s0 + $0x54] ss:$36 sps:$4 sm:$0xff]   ;;  %v1713_v16 = vld [vmem:[%s2254_s0 + $0x64] ss:$36 sps:$4 sm:$0xff]  }
  0x4d   :  { %1156 = vmatprep.subr.bf16.mxu0 %v1620_v17  ;;  %1076 = vmatprep.mubr.bf16.mxu1 %v1701_v41  ;;  %v1708_v17 = vld [vmem:[%s2253_s1 + $0x410] ss:$8 sps:$4 sm:$0xff]  }
  0x4e   :  { %1182 = vmatprep.mubr.bf16.mxu0 %v1704_v43 }
  0x4f   :  { %1051 = vmatpush1.bf16.msra.mxu1 %v1615_v18  ;;  %v1719_v18 = vld [vmem:[%s2253_s1 + $0x424] ss:$8 sps:$4 sm:$0xff]  }
  0x50   :  { %1157 = vmatpush1.bf16.msra.mxu0 %v1618_v19  ;;  %1052 = vmatprep.subr.bf16.mxu1 %v1623_v20  ;;  %v1715_v19 = vld [vmem:[%s2254_s0 + $0x50] ss:$36 sps:$4 sm:$0xff]   ;;  %v1716_v20 = vld [vmem:[%s2254_s0 + $0x60] ss:$36 sps:$4 sm:$0xff]  }
  0x51   :  { %1158 = vmatprep.subr.bf16.mxu0 %v1626_v21  ;;  %v1717_v21 = vld [vmem:[%s2253_s1 + $0x420] ss:$8 sps:$4 sm:$0xff]  }
  0x53   :  { %1053 = vmatpush1.bf16.msra.mxu1 %v1621_v22  ;;  %v1722_v22 = vld [vmem:[%s2253_s1 + $0x434] ss:$8 sps:$4 sm:$0xff]  }
  0x54   :  { %1159 = vmatpush1.bf16.msra.mxu0 %v1624_v23  ;;  %1054 = vmatprep.subr.bf16.mxu1 %v1629_v24  ;;  %v1720_v23 = vld [vmem:[%s2253_s1 + $0x430] ss:$8 sps:$4 sm:$0xff]   ;;  %v1725_v24 = vld [vmem:[%s2253_s1 + $0x444] ss:$8 sps:$4 sm:$0xff]  }
  0x55   :  { %1160 = vmatprep.subr.bf16.mxu0 %v1632_v25  ;;  %v1737_v25 = vmov 0  }
  0x57   :  { %1055 = vmatpush1.bf16.msra.mxu1 %v1627_v26  ;;  %v1723_v26 = vld [vmem:[%s2253_s1 + $0x440] ss:$8 sps:$4 sm:$0xff]  }
  0x58   :  { %1161 = vmatpush1.bf16.msra.mxu0 %v1630_v27  ;;  %1056 = vmatprep.subr.bf16.mxu1 %v1635_v28  ;;  %v1728_v27 = vld [vmem:[%s2253_s1 + $0x454] ss:$8 sps:$4 sm:$0xff]   ;;  %v1726_v28 = vld [vmem:[%s2253_s1 + $0x450] ss:$8 sps:$4 sm:$0xff]  }
  0x59   :  { %1162 = vmatprep.subr.bf16.mxu0 %v1638_v32  ;;  %v1732_v32 = vld [vmem:[%s2253_s1 + $0x470] ss:$8 sps:$4 sm:$0xff]  }
  0x5b   :  { %1057 = vmatpush1.bf16.msra.mxu1 %v1633_v34  ;;  %v1736_v34 = vld [vmem:[%s2254_s0 + $0x68] ss:$36 sps:$4 sm:$0xff]  }
  0x5c   :  { %1163 = vmatpush1.bf16.msra.mxu0 %v1636_v35  ;;  %1058 = vmatprep.subr.bf16.mxu1 %v1641_v36 }
  0x5d   :  { %1164 = vmatprep.subr.bf16.mxu0 %v1644_v37 }
  0x5f   :  { %1059 = vmatpush1.bf16.msra.mxu1 %v1639_v38 }
  0x60   :  { %1165 = vmatpush1.bf16.msra.mxu0 %v1642_v39  ;;  %1060 = vmatprep.subr.bf16.mxu1 %v1647_v40 }
  0x61   :  { %1166 = vmatprep.subr.bf16.mxu0 %v1650_v42 }
  0x63   :  { %1061 = vmatpush1.bf16.msra.mxu1 %v1645_v44 }
  0x64   :  { %1167 = vmatpush1.bf16.msra.mxu0 %v1648_v45  ;;  %1062 = vmatprep.subr.bf16.mxu1 %v1653_v46 }
  0x65   :  { %1168 = vmatprep.subr.bf16.mxu0 %v1656_v47 }
  0x67   :  { %1063 = vmatpush1.bf16.msra.mxu1 %v1651_v48 }
  0x68   :  { %1169 = vmatpush1.bf16.msra.mxu0 %v1654_v49  ;;  %1064 = vmatprep.subr.bf16.mxu1 %v1659_v50 }
  0x69   :  { %1170 = vmatprep.subr.bf16.mxu0 %v1662_v51  ;;  %v1264_v51 = vlaneseq }
  0x6b   :  { %1065 = vmatpush1.bf16.msra.mxu1 %v1657_v52  ;;  %v1265_v52 = vshrl.u32 %v1264_v51, 7 }
  0x6c   :  { %1171 = vmatpush1.bf16.msra.mxu0 %v1660_v53  ;;  %1066 = vmatprep.subr.bf16.mxu1 %v1665_v54 }
  0x6d   :  { %1172 = vmatprep.subr.bf16.mxu0 %v1668_v55 }
  0x6f   :  { %1067 = vmatpush1.bf16.msra.mxu1 %v1663_v56 }
  0x70   :  { %1173 = vmatpush1.bf16.msra.mxu0 %v1666_v57  ;;  %1068 = vmatprep.subr.bf16.mxu1 %v1671_v58 }
  0x71   :  { %1174 = vmatprep.subr.bf16.mxu0 %v1674_v59  ;;  %v1266_v59 = vsub.s32 0, %v1265_v52 }
  0x73   :  { %1069 = vmatpush1.bf16.msra.mxu1 %v1669_v60 }
  0x74   :  { %1175 = vmatpush1.bf16.msra.mxu0 %v1672_v61  ;;  %1070 = vmatprep.subr.bf16.mxu1 %v1677_v62 }
  0x75   :  { %1176 = vmatprep.subr.bf16.mxu0 %v1680_v63 }
  0x77   :  { %1071 = vmatpush1.bf16.msra.mxu1 %v1675_v0  ;;  %v1262_v0 = vld [vmem:[%s2255_s2] sm:$0x3] }
  0x78   :  { %1177 = vmatpush1.bf16.msra.mxu0 %v1678_v1  ;;  %1072 = vmatprep.subr.bf16.mxu1 %v1688_v2  ;;  %v1270_v1 = vsub.s32 1, %v1265_v52 }
  0x79   :  { %1178 = vmatprep.subr.bf16.mxu0 %v1692_v3 }
  0x7b   :  { %1073 = vmatpush1.bf16.msra.mxu1 %v1686_v4 }
  0x7c   :  { %1179 = vmatpush1.bf16.msra.mxu0 %v1690_v5  ;;  %1074 = vmatprep.subr.bf16.mxu1 %v1695_v6 }
  0x7d   :  { %1180 = vmatprep.subr.bf16.mxu0 %v1698_v7 }
  0x7f   :  { %1075 = vmatpush1.bf16.msra.mxu1 %v1693_v8 }
  0x80   :  { %1181 = vmatpush1.bf16.msra.mxu0 %v1696_v9  ;;  %1446 = vmatprep.subr.bf16.mxu1 %v1707_v10 }
  0x81   :  { %1203 = vmatprep.subr.bf16.mxu0 %v1707_v10 }
  0x82   :  { %1077 = vmatmul.mubr.bf16.vlgmr.msra.gmra.mrb[0].mxu1 %v1699_v11  ;;  %v1267_v11 = vrot.slane %v1262_v0, %v1266_v59 }
  0x83   :  { %1183 = vmatmul.mubr.bf16.vlgmr.msra.gmra.mrb[0].mxu0 %v1702_v12  ;;  %1454 = vmatpush1.bf16.msra.mxu1 %v1705_v13 }
  0x84   :  { %1204 = vmatpush1.bf16.msra.mxu0 %v1705_v13  ;;  %1447 = vmatprep.subr.bf16.mxu1 %v1710_v14  ;;  %v1271_v13 = vrot.slane %v1262_v0, %v1270_v1 }
  0x85   :  { %1205 = vmatprep.subr.bf16.mxu0 %v1710_v14  ;;  %1086 = vmatprep.mubr.bf16.mxu1 %v1711_v15 }
  0x86   :  { %1192 = vmatprep.mubr.bf16.mxu0 %v1713_v16 }
  0x87   :  { %1455 = vmatpush1.bf16.msra.mxu1 %v1708_v17 }
  0x88   :  { %1206 = vmatpush1.bf16.msra.mxu0 %v1708_v17  ;;  %1448 = vmatprep.subr.bf16.mxu1 %v1719_v18 }
  0x89   :  { %1207 = vmatprep.subr.bf16.mxu0 %v1719_v18 }
  0x8a   :  { %1087 = vmatmul.mubr.bf16.gmra.mrb[4].mxu1 %v1715_v19 }
  0x8b   :  { %1193 = vmatmul.mubr.bf16.gmra.mrb[4].mxu0 %v1716_v20  ;;  %1456 = vmatpush1.bf16.msra.mxu1 %v1717_v21 }
  0x8c   :  { %1208 = vmatpush1.bf16.msra.mxu0 %v1717_v21  ;;  %1449 = vmatprep.subr.bf16.mxu1 %v1722_v22 }
  0x8d   :  { %1209 = vmatprep.subr.bf16.mxu0 %v1722_v22  ;;  %1235 = vmatprep.mubr.bf16.mxu0 %v1737_v25 }
  0x8e   :  { %1245 = vmatprep.mubr.bf16.mxu1 %v1737_v25 }
  0x8f   :  { %1457 = vmatpush1.bf16.msra.mxu1 %v1720_v23 }
  0x90   :  { %1210 = vmatpush1.bf16.msra.mxu0 %v1720_v23  ;;  %1450 = vmatprep.subr.bf16.mxu1 %v1725_v24 }
  0x91   :  { %1211 = vmatprep.subr.bf16.mxu0 %v1725_v24 }
  0x93   :  { %1458 = vmatpush1.bf16.msra.mxu1 %v1723_v26 }
  0x94   :  { %1212 = vmatpush1.bf16.msra.mxu0 %v1723_v26  ;;  %1451 = vmatprep.subr.bf16.mxu1 %v1728_v27 }
  0x95   :  { %1213 = vmatprep.subr.bf16.mxu0 %v1728_v27 }
  0x97   :  { %1459 = vmatpush1.bf16.msra.mxu1 %v1726_v28 }
  0x98   :  { %1214 = vmatpush1.bf16.msra.mxu0 %v1726_v28  ;;  %1452 = vmatprep.subr.bf16.mxu1 %v1731_v29 }
  0x99   :  { %1215 = vmatprep.subr.bf16.mxu0 %v1731_v29 }
  0x9b   :  { %1460 = vmatpush1.bf16.msra.mxu1 %v1729_v30 }
  0x9c   :  { %1216 = vmatpush1.bf16.msra.mxu0 %v1729_v30  ;;  %1453 = vmatprep.subr.bf16.mxu1 %v1734_v31 }
  0x9d   :  { %1217 = vmatprep.subr.bf16.mxu0 %v1734_v31 }
  0x9f   :  { %1461 = vmatpush1.bf16.msra.mxu1 %v1732_v32 }
  0xa0   :  { %1218 = vmatpush1.bf16.msra.mxu0 %v1732_v32 }
  0xa2   :  { %1246 = vmatmul.mubr.bf16.vlgmr.msra.gmra.mrb[8].mxu1 %v1736_v34 }
  0xa3   :  { %1236 = vmatmul.mubr.bf16.vlgmr.msra.gmra.mrb[0].mxu0 %v1735_v33 }
 0x155   :  { %v1078_v35 = vpop.f32.mrb[0].mxu1 }
 0x156   :  { %v1080_v36 = vpop.f32.mrb[1].mxu1 }
 0x157   :  { %v1082_v37 = vpop.f32.mrb[2].mxu1 }
 0x158   :  { %v1084_v38 = vpop.f32.mrb[3].mxu1 }
 0x15d   :  { %v1088_v39 = vpop.f32.mrb[4].mxu1 }
 0x15e   :  { %v1194_v40 = vpop.f32.mrb[4].mxu0  ;;  %v1090_v42 = vpop.f32.mrb[5].mxu1 }
 0x15f   :  { %v1466_v41 = vadd.f32 %v1194_v40, %v1088_v39  ;;  %v1196_v43 = vpop.f32.mrb[5].mxu0  ;;  %v1092_v45 = vpop.f32.mrb[6].mxu1 }
 0x160   :  { %v1468_v44 = vadd.f32 %v1196_v43, %v1090_v42  ;;  %v1198_v46 = vpop.f32.mrb[6].mxu0  ;;  %v1094_v48 = vpop.f32.mrb[7].mxu1 }
 0x161   :  { %v1470_v47 = vadd.f32 %v1198_v46, %v1092_v45  ;;  %v1200_v49 = vpop.f32.mrb[7].mxu0 }
 0x162   :  { %v1472_v50 = vadd.f32 %v1200_v49, %v1094_v48 }
 0x175   :  { %v1247_v54 = vpop.f32.mrb[8].mxu1 }
 0x176   :  { %v1237_v53 = vpop.f32.mrb[0].mxu0  ;;  %v1467_v56 = vadd.f32 %v1466_v41, %v1247_v54  ;;  %v1249_v58 = vpop.f32.mrb[9].mxu1 }
 0x177   :  { %v1462_v55 = vadd.f32 %v1237_v53, %v1078_v35  ;;  %v1239_v57 = vpop.f32.mrb[1].mxu0  ;;  %v1469_v61 = vadd.f32 %v1468_v44, %v1249_v58  ;;  %v1251_v63 = vpop.f32.mrb[10].mxu1 }
 0x178   :  { %v1463_v60 = vadd.f32 %v1239_v57, %v1080_v36  ;;  %v1241_v62 = vpop.f32.mrb[2].mxu0  ;;  %v1471_v4 = vadd.f32 %v1470_v47, %v1251_v63  ;;  %v1253_v6 = vpop.f32.mrb[11].mxu1 }
 0x179   :  { %v1256_v2 = vmax.f32 %v1462_v55, %v1467_v56  ;;  %v1464_v3 = vadd.f32 %v1241_v62, %v1082_v37  ;;  %v1243_v5 = vpop.f32.mrb[3].mxu0  ;;  %v1473_v9 = vadd.f32 %v1472_v50, %v1253_v6 }
 0x17a   :  { %v1259_v7 = vmax.f32 %v1463_v60, %v1469_v61  ;;  %v1465_v8 = vadd.f32 %v1243_v5, %v1084_v38 }
 0x17b   :  { %v1257_v10 = vmax.f32 %v1464_v3, %v1471_v4 }
 0x17c   :  { %v1260_v12 = vmax.f32 %v1465_v8, %v1473_v9 }
 0x17d   :  { %v1258_v14 = vmax.f32 %v1256_v2, %v1257_v10 }
 0x17e   :  { %v1261_v15 = vmax.f32 %v1259_v7, %v1260_v12 }
 0x17f   :  { %v1274_v16 = vadd.f32 %v1267_v11, %v1258_v14 }
 0x180   :  { %v1275_v17 = vadd.f32 %v1271_v13, %v1261_v15 }
 0x181   :  { %v1276_v18 = vmax.f32 %v1274_v16, 0.0 }
 0x182   :  { %v1277_v19 = vmax.f32 %v1275_v17, 0.0 }
 0x183   :  { %1278 = vst [vmem:[%s2256_s3] sm:$0xff] %v1276_v18 }
 0x184   :  { %1279 = vst [vmem:[%s2256_s3 + $0x8] sm:$0xff] %v1277_v19 }

// kernel: forward.7
= control target key start
LH: loop header
LB: loop body
LE: loop exit
PB: predicated region body
PF: predicated region fallthrough
CT: control target
= control target key end

     0   :  { %vm52_vm0 = vcmask 1043456   ;;  %vm348_vm1 = vcmask 1041409   ;;  %vm350_vm2 = vcmask 1042434   ;;  %vm352_vm3 = vcmask 1043459   ;;  %s1925_s1 = inlined_call_operand.vmem [shape: f32[256,512], index: 1, kind: input, shape index: {}]   ;;  %s1926_s0 = inlined_call_operand.vmem [shape: f32[8,4,256], index: 0, kind: input, shape index: {}]   ;;  %s1927_s3 = inlined_call_operand.vmem [shape: f32[512,38], index: 3, kind: input, shape index: {}]   ;;  %s1928_s2 = inlined_call_operand.vmem [shape: f32[1,512], index: 2, kind: input, shape index: {}]   ;;  %s1929_s4 = inlined_call_operand.vmem [shape: f32[1,38], index: 4, kind: input, shape index: {}]   ;;  %s1930_s5 = inlined_call_operand.vmem [shape: f32[8,38], index: 5, kind: output, shape index: {}]  }
   0x1   :  { %v183_v0 = vld [vmem:[%s1925_s1 + $0x8] sm:$0xff]  ;;  %v185_v2 = vld [vmem:[%s1925_s1 + $0x18] sm:$0xff]  ;;  %v182_v5 = vld [vmem:[%s1925_s1] sm:$0xff]  ;;  %vm354_vm4 = vcmask 1044484   ;;  %vm356_vm5 = vcmask 1045509   ;;  %vm358_vm6 = vcmask 1046534  }
   0x2   :  { %v187_v1 = vld [vmem:[%s1925_s1 + $0x28] sm:$0xff]  ;;  %v189_v4 = vld [vmem:[%s1925_s1 + $0x38] sm:$0xff]  ;;  %v186_v6 = vld [vmem:[%s1925_s1 + $0x20] sm:$0xff]  ;;  %vm360_vm7 = vcmask 1047559   ;;  %vm728_vm8 = vcmask 310272  }
   0x3   :  { %v805_v3 = vpack.c.bf16 %v187_v1, %v183_v0  ;;  %v869_v7 = vpack.c.bf16 %v189_v4, %v185_v2  ;;  %v807_v8 = vpack.c.bf16 %v186_v6, %v182_v5  ;;  %v184_v9 = vld [vmem:[%s1925_s1 + $0x10] sm:$0xff]  ;;  %v191_v11 = vld [vmem:[%s1925_s1 + $0x48] sm:$0xff]  ;;  %v193_v14 = vld [vmem:[%s1925_s1 + $0x58] sm:$0xff] }
   0x4   :  { %v188_v10 = vld [vmem:[%s1925_s1 + $0x30] sm:$0xff]  ;;  %v195_v13 = vld [vmem:[%s1925_s1 + $0x68] sm:$0xff]  ;;  %v197_v15 = vld [vmem:[%s1925_s1 + $0x78] sm:$0xff] }
   0x5   :  { %806 = vmatprep.subr.bf16.mxu0 %v805_v3  ;;  %v871_v12 = vpack.c.bf16 %v188_v10, %v184_v9  ;;  %870 = vmatprep.subr.bf16.mxu1 %v869_v7  ;;  %v809_v16 = vpack.c.bf16 %v195_v13, %v191_v11  ;;  %v873_v17 = vpack.c.bf16 %v197_v15, %v193_v14  ;;  %v190_v18 = vld [vmem:[%s1925_s1 + $0x40] sm:$0xff]  ;;  %v192_v20 = vld [vmem:[%s1925_s1 + $0x50] sm:$0xff]  ;;  %v199_v23 = vld [vmem:[%s1925_s1 + $0x88] sm:$0xff] }
   0x6   :  { %808 = vmatpush1.bf16.msra.mxu0 %v807_v8  ;;  %v194_v19 = vld [vmem:[%s1925_s1 + $0x60] sm:$0xff]  ;;  %v196_v22 = vld [vmem:[%s1925_s1 + $0x70] sm:$0xff]  ;;  %v203_v24 = vld [vmem:[%s1925_s1 + $0xa8] sm:$0xff] }
   0x7   :  { %872 = vmatpush1.bf16.msra.mxu1 %v871_v12  ;;  %v811_v21 = vpack.c.bf16 %v194_v19, %v190_v18  ;;  %810 = vmatprep.subr.bf16.mxu0 %v809_v16  ;;  %v875_v25 = vpack.c.bf16 %v196_v22, %v192_v20  ;;  %v813_v26 = vpack.c.bf16 %v203_v24, %v199_v23  ;;  %v201_v27 = vld [vmem:[%s1925_s1 + $0x98] sm:$0xff]  ;;  %v198_v29 = vld [vmem:[%s1925_s1 + $0x80] sm:$0xff]  ;;  %v200_v32 = vld [vmem:[%s1925_s1 + $0x90] sm:$0xff] }
   0x8   :  { %874 = vmatprep.subr.bf16.mxu1 %v873_v17  ;;  %v205_v28 = vld [vmem:[%s1925_s1 + $0xb8] sm:$0xff]  ;;  %v202_v31 = vld [vmem:[%s1925_s1 + $0xa0] sm:$0xff]  ;;  %v204_v33 = vld [vmem:[%s1925_s1 + $0xb0] sm:$0xff] }
   0x9   :  { %v877_v30 = vpack.c.bf16 %v205_v28, %v201_v27  ;;  %v815_v34 = vpack.c.bf16 %v202_v31, %v198_v29  ;;  %v207_v35 = vld [vmem:[%s1925_s1 + $0xc8] sm:$0xff]  ;;  %v209_v37 = vld [vmem:[%s1925_s1 + $0xd8] sm:$0xff]  ;;  %v879_v38 = vpack.c.bf16 %v204_v33, %v200_v32  ;;  %v206_v41 = vld [vmem:[%s1925_s1 + $0xc0] sm:$0xff] }
   0xa   :  { %812 = vmatpush1.bf16.msra.mxu0 %v811_v21  ;;  %v211_v36 = vld [vmem:[%s1925_s1 + $0xe8] sm:$0xff]  ;;  %v213_v40 = vld [vmem:[%s1925_s1 + $0xf8] sm:$0xff]  ;;  %v210_v42 = vld [vmem:[%s1925_s1 + $0xe0] sm:$0xff] }
   0xb   :  { %876 = vmatpush1.bf16.msra.mxu1 %v875_v25  ;;  %814 = vmatprep.subr.bf16.mxu0 %v813_v26  ;;  %v817_v39 = vpack.c.bf16 %v211_v36, %v207_v35  ;;  %v881_v43 = vpack.c.bf16 %v213_v40, %v209_v37  ;;  %v208_v44 = vld [vmem:[%s1925_s1 + $0xd0] sm:$0xff]  ;;  %v215_v46 = vld [vmem:[%s1925_s1 + $0x108] sm:$0xff]  ;;  %v217_v48 = vld [vmem:[%s1925_s1 + $0x118] sm:$0xff]  ;;  %v819_v50 = vpack.c.bf16 %v210_v42, %v206_v41 }
   0xc   :  { %878 = vmatprep.subr.bf16.mxu1 %v877_v30  ;;  %v212_v45 = vld [vmem:[%s1925_s1 + $0xf0] sm:$0xff]  ;;  %v219_v47 = vld [vmem:[%s1925_s1 + $0x128] sm:$0xff]  ;;  %v221_v49 = vld [vmem:[%s1925_s1 + $0x138] sm:$0xff] }
   0xd   :  { %v883_v51 = vpack.c.bf16 %v212_v45, %v208_v44  ;;  %v821_v52 = vpack.c.bf16 %v219_v47, %v215_v46  ;;  %v214_v53 = vld [vmem:[%s1925_s1 + $0x100] sm:$0xff]  ;;  %v216_v55 = vld [vmem:[%s1925_s1 + $0x110] sm:$0xff]  ;;  %v885_v56 = vpack.c.bf16 %v221_v49, %v217_v48  ;;  %v223_v58 = vld [vmem:[%s1925_s1 + $0x148] sm:$0xff] }
   0xe   :  { %816 = vmatpush1.bf16.msra.mxu0 %v815_v34  ;;  %v218_v54 = vld [vmem:[%s1925_s1 + $0x120] sm:$0xff]  ;;  %v220_v57 = vld [vmem:[%s1925_s1 + $0x130] sm:$0xff]  ;;  %v227_v59 = vld [vmem:[%s1925_s1 + $0x168] sm:$0xff] }
   0xf   :  { %880 = vmatpush1.bf16.msra.mxu1 %v879_v38  ;;  %818 = vmatprep.subr.bf16.mxu0 %v817_v39  ;;  %v225_v60 = vld [vmem:[%s1925_s1 + $0x158] sm:$0xff]  ;;  %v823_v62 = vpack.c.bf16 %v218_v54, %v214_v53  ;;  %v887_v63 = vpack.c.bf16 %v220_v57, %v216_v55  ;;  %v825_v0 = vpack.c.bf16 %v227_v59, %v223_v58  ;;  %v222_v1 = vld [vmem:[%s1925_s1 + $0x140] sm:$0xff]  ;;  %v224_v3 = vld [vmem:[%s1925_s1 + $0x150] sm:$0xff] }
  0x10   :  { %882 = vmatprep.subr.bf16.mxu1 %v881_v43  ;;  %v229_v61 = vld [vmem:[%s1925_s1 + $0x178] sm:$0xff]  ;;  %v226_v2 = vld [vmem:[%s1925_s1 + $0x160] sm:$0xff]  ;;  %v228_v5 = vld [vmem:[%s1925_s1 + $0x170] sm:$0xff] }
  0x11   :  { %v889_v4 = vpack.c.bf16 %v229_v61, %v225_v60  ;;  %v231_v6 = vld [vmem:[%s1925_s1 + $0x188] sm:$0xff]  ;;  %v233_v8 = vld [vmem:[%s1925_s1 + $0x198] sm:$0xff]  ;;  %v827_v10 = vpack.c.bf16 %v226_v2, %v222_v1  ;;  %v891_v11 = vpack.c.bf16 %v228_v5, %v224_v3  ;;  %v230_v13 = vld [vmem:[%s1925_s1 + $0x180] sm:$0xff] }
  0x12   :  { %820 = vmatpush1.bf16.msra.mxu0 %v819_v50  ;;  %v235_v7 = vld [vmem:[%s1925_s1 + $0x1a8] sm:$0xff]  ;;  %v237_v9 = vld [vmem:[%s1925_s1 + $0x1b8] sm:$0xff]  ;;  %v234_v14 = vld [vmem:[%s1925_s1 + $0x1a0] sm:$0xff] }
  0x13   :  { %884 = vmatpush1.bf16.msra.mxu1 %v883_v51  ;;  %822 = vmatprep.subr.bf16.mxu0 %v821_v52  ;;  %v829_v12 = vpack.c.bf16 %v235_v7, %v231_v6  ;;  %v232_v15 = vld [vmem:[%s1925_s1 + $0x190] sm:$0xff]  ;;  %v893_v16 = vpack.c.bf16 %v237_v9, %v233_v8  ;;  %v239_v18 = vld [vmem:[%s1925_s1 + $0x1c8] sm:$0xff]  ;;  %v241_v20 = vld [vmem:[%s1925_s1 + $0x1d8] sm:$0xff]  ;;  %v831_v22 = vpack.c.bf16 %v234_v14, %v230_v13 }
  0x14   :  { %886 = vmatprep.subr.bf16.mxu1 %v885_v56  ;;  %v236_v17 = vld [vmem:[%s1925_s1 + $0x1b0] sm:$0xff]  ;;  %v243_v19 = vld [vmem:[%s1925_s1 + $0x1e8] sm:$0xff]  ;;  %v245_v21 = vld [vmem:[%s1925_s1 + $0x1f8] sm:$0xff] }
  0x15   :  { %v895_v23 = vpack.c.bf16 %v236_v17, %v232_v15  ;;  %v833_v24 = vpack.c.bf16 %v243_v19, %v239_v18  ;;  %v238_v25 = vld [vmem:[%s1925_s1 + $0x1c0] sm:$0xff]  ;;  %v240_v27 = vld [vmem:[%s1925_s1 + $0x1d0] sm:$0xff]  ;;  %v897_v28 = vpack.c.bf16 %v245_v21, %v241_v20  ;;  %v247_v30 = vld [vmem:[%s1925_s1 + $0x208] sm:$0xff] }
  0x16   :  { %824 = vmatpush1.bf16.msra.mxu0 %v823_v62  ;;  %v242_v26 = vld [vmem:[%s1925_s1 + $0x1e0] sm:$0xff]  ;;  %v244_v29 = vld [vmem:[%s1925_s1 + $0x1f0] sm:$0xff]  ;;  %v251_v31 = vld [vmem:[%s1925_s1 + $0x228] sm:$0xff] }
  0x17   :  { %888 = vmatpush1.bf16.msra.mxu1 %v887_v63  ;;  %826 = vmatprep.subr.bf16.mxu0 %v825_v0  ;;  %v249_v32 = vld [vmem:[%s1925_s1 + $0x218] sm:$0xff]  ;;  %v835_v34 = vpack.c.bf16 %v242_v26, %v238_v25  ;;  %v246_v35 = vld [vmem:[%s1925_s1 + $0x200] sm:$0xff]  ;;  %v899_v37 = vpack.c.bf16 %v244_v29, %v240_v27  ;;  %v837_v38 = vpack.c.bf16 %v251_v31, %v247_v30  ;;  %v248_v39 = vld [vmem:[%s1925_s1 + $0x210] sm:$0xff] }
  0x18   :  { %890 = vmatprep.subr.bf16.mxu1 %v889_v4  ;;  %v253_v33 = vld [vmem:[%s1925_s1 + $0x238] sm:$0xff]  ;;  %v250_v36 = vld [vmem:[%s1925_s1 + $0x220] sm:$0xff]  ;;  %v252_v40 = vld [vmem:[%s1925_s1 + $0x230] sm:$0xff] }
  0x19   :  { %v255_v41 = vld [vmem:[%s1925_s1 + $0x248] sm:$0xff]  ;;  %v901_v42 = vpack.c.bf16 %v253_v33, %v249_v32  ;;  %v257_v44 = vld [vmem:[%s1925_s1 + $0x258] sm:$0xff]  ;;  %v1266_v46 = vld [vmem:[%s1925_s1 + $0x240] sm:$0xff]  ;;  %v839_v50 = vpack.c.bf16 %v250_v36, %v246_v35  ;;  %v903_v57 = vpack.c.bf16 %v252_v40, %v248_v39 }
  0x1a   :  { %828 = vmatpush1.bf16.msra.mxu0 %v827_v10  ;;  %v259_v43 = vld [vmem:[%s1925_s1 + $0x268] sm:$0xff]  ;;  %v261_v45 = vld [vmem:[%s1925_s1 + $0x278] sm:$0xff]  ;;  %v1271_v47 = vld [vmem:[%s1925_s1 + $0x260] sm:$0xff] }
  0x1b   :  { %892 = vmatpush1.bf16.msra.mxu1 %v891_v11  ;;  %830 = vmatprep.subr.bf16.mxu0 %v829_v12  ;;  %v1276_v48 = vld [vmem:[%s1925_s1 + $0x250] sm:$0xff]  ;;  %v1286_v51 = vld [vmem:[%s1925_s1 + $0x288] sm:$0xff]  ;;  %v1296_v53 = vld [vmem:[%s1925_s1 + $0x298] sm:$0xff]  ;;  %v841_v58 = vpack.c.bf16 %v259_v43, %v255_v41  ;;  %v905_v3 = vpack.c.bf16 %v261_v45, %v257_v44  ;;  %v843_v18 = vpack.c.bf16 %v1271_v47, %v1266_v46 }
  0x1c   :  { %894 = vmatprep.subr.bf16.mxu1 %v893_v16  ;;  %v1281_v49 = vld [vmem:[%s1925_s1 + $0x270] sm:$0xff]  ;;  %v1291_v52 = vld [vmem:[%s1925_s1 + $0x2a8] sm:$0xff]  ;;  %v1301_v54 = vld [vmem:[%s1925_s1 + $0x2b8] sm:$0xff] }
  0x1d   :  { %v1306_v55 = vld [vmem:[%s1925_s1 + $0x280] sm:$0xff]  ;;  %v1316_v59 = vld [vmem:[%s1925_s1 + $0x290] sm:$0xff]  ;;  %v1326_v61 = vld [vmem:[%s1925_s1 + $0x2c8] sm:$0xff]  ;;  %v907_v19 = vpack.c.bf16 %v1281_v49, %v1276_v48 }
  0x1e   :  { %832 = vmatpush1.bf16.msra.mxu0 %v831_v22  ;;  %v1311_v56 = vld [vmem:[%s1925_s1 + $0x2a0] sm:$0xff]  ;;  %v1321_v60 = vld [vmem:[%s1925_s1 + $0x2b0] sm:$0xff]  ;;  %v1331_v62 = vld [vmem:[%s1925_s1 + $0x2e8] sm:$0xff] }
  0x1f   :  { %896 = vmatpush1.bf16.msra.mxu1 %v895_v23  ;;  %834 = vmatprep.subr.bf16.mxu0 %v833_v24  ;;  %v1336_v63 = vld [vmem:[%s1925_s1 + $0x2d8] sm:$0xff]  ;;  %v1346_v1 = vld [vmem:[%s1925_s1 + $0x2c0] sm:$0xff]  ;;  %v1356_v4 = vld [vmem:[%s1925_s1 + $0x2d0] sm:$0xff]  ;;  %v845_v23 = vpack.c.bf16 %v1291_v52, %v1286_v51  ;;  %v909_v24 = vpack.c.bf16 %v1301_v54, %v1296_v53  ;;  %v847_v25 = vpack.c.bf16 %v1311_v56, %v1306_v55 }
  0x20   :  { %898 = vmatprep.subr.bf16.mxu1 %v897_v28  ;;  %v1341_v0 = vld [vmem:[%s1925_s1 + $0x2f8] sm:$0xff]  ;;  %v1351_v2 = vld [vmem:[%s1925_s1 + $0x2e0] sm:$0xff]  ;;  %v1361_v5 = vld [vmem:[%s1925_s1 + $0x2f0] sm:$0xff]  ;;  %v911_v29 = vpack.c.bf16 %v1321_v60, %v1316_v59  ;;  %v849_v30 = vpack.c.bf16 %v1331_v62, %v1326_v61 }
  0x21   :  { %v1366_v6 = vld [vmem:[%s1925_s1 + $0x308] sm:$0xff]  ;;  %v1376_v8 = vld [vmem:[%s1925_s1 + $0x318] sm:$0xff]  ;;  %v1386_v10 = vld [vmem:[%s1925_s1 + $0x300] sm:$0xff]  ;;  %v913_v31 = vpack.c.bf16 %v1341_v0, %v1336_v63  ;;  %v851_v32 = vpack.c.bf16 %v1351_v2, %v1346_v1 }
  0x22   :  { %836 = vmatpush1.bf16.msra.mxu0 %v835_v34  ;;  %v1371_v7 = vld [vmem:[%s1925_s1 + $0x328] sm:$0xff]  ;;  %v1381_v9 = vld [vmem:[%s1925_s1 + $0x338] sm:$0xff]  ;;  %v1391_v11 = vld [vmem:[%s1925_s1 + $0x320] sm:$0xff] }
  0x23   :  { %900 = vmatpush1.bf16.msra.mxu1 %v899_v37  ;;  %838 = vmatprep.subr.bf16.mxu0 %v837_v38  ;;  %v1396_v12 = vld [vmem:[%s1925_s1 + $0x310] sm:$0xff]  ;;  %v1406_v14 = vld [vmem:[%s1925_s1 + $0x348] sm:$0xff]  ;;  %v1416_v16 = vld [vmem:[%s1925_s1 + $0x358] sm:$0xff]  ;;  %v1937_v1 = vpack.c.bf16 %v1381_v9, %v1376_v8 }
  0x24   :  { %902 = vmatprep.subr.bf16.mxu1 %v901_v42  ;;  %v1401_v13 = vld [vmem:[%s1925_s1 + $0x330] sm:$0xff]  ;;  %v1411_v15 = vld [vmem:[%s1925_s1 + $0x368] sm:$0xff]  ;;  %v1421_v17 = vld [vmem:[%s1925_s1 + $0x378] sm:$0xff] }
  0x25   :  { %v1430_v20 = vld [vmem:[%s1925_s1 + $0x340] sm:$0xff]  ;;  %v1440_v22 = vld [vmem:[%s1925_s1 + $0x350] sm:$0xff]  ;;  %v1456_v27 = vld [vmem:[%s1925_s1 + $0x388] sm:$0xff]  ;;  %v1939_v9 = vpack.c.bf16 %v1401_v13, %v1396_v12 }
  0x26   :  { %840 = vmatpush1.bf16.msra.mxu0 %v839_v50  ;;  %v1435_v21 = vld [vmem:[%s1925_s1 + $0x360] sm:$0xff]  ;;  %v1451_v26 = vld [vmem:[%s1925_s1 + $0x370] sm:$0xff]  ;;  %v1461_v28 = vld [vmem:[%s1925_s1 + $0x3a8] sm:$0xff] }
  0x27   :  { %904 = vmatpush1.bf16.msra.mxu1 %v903_v57  ;;  %842 = vmatprep.subr.bf16.mxu0 %v841_v58  ;;  %v1474_v33 = vld [vmem:[%s1925_s1 + $0x398] sm:$0xff]  ;;  %v1484_v35 = vld [vmem:[%s1925_s1 + $0x380] sm:$0xff]  ;;  %v1502_v41 = vld [vmem:[%s1925_s1 + $0x390] sm:$0xff] }
  0x28   :  { %906 = vmatprep.subr.bf16.mxu1 %v905_v3  ;;  %v1479_v34 = vld [vmem:[%s1925_s1 + $0x3b8] sm:$0xff]  ;;  %v1497_v40 = vld [vmem:[%s1925_s1 + $0x3a0] sm:$0xff]  ;;  %v1507_v42 = vld [vmem:[%s1925_s1 + $0x3b0] sm:$0xff] }
  0x29   :  { %v1520_v47 = vld [vmem:[%s1925_s1 + $0x3c8] sm:$0xff]  ;;  %v1530_v49 = vld [vmem:[%s1925_s1 + $0x3d8] sm:$0xff]  ;;  %v1546_v54 = vld [vmem:[%s1925_s1 + $0x3c0] sm:$0xff] }
  0x2a   :  { %844 = vmatpush1.bf16.msra.mxu0 %v843_v18  ;;  %v1525_v48 = vld [vmem:[%s1925_s1 + $0x3e8] sm:$0xff]  ;;  %v1541_v53 = vld [vmem:[%s1925_s1 + $0x3f8] sm:$0xff]  ;;  %v1551_v55 = vld [vmem:[%s1925_s1 + $0x3e0] sm:$0xff] }
  0x2b   :  { %908 = vmatpush1.bf16.msra.mxu1 %v907_v19  ;;  %846 = vmatprep.subr.bf16.mxu0 %v845_v23  ;;  %v1564_v60 = vld [vmem:[%s1925_s1 + $0x3d0] sm:$0xff]  ;;  %v20_v62 = vld [vmem:[%s1926_s0] sm:$0xff]  ;;  %v1581_v3 = vld [vmem:[%s1926_s0 + $0x8] sm:$0xff] }
  0x2c   :  { %910 = vmatprep.subr.bf16.mxu1 %v909_v24  ;;  %v1569_v61 = vld [vmem:[%s1925_s1 + $0x3f0] sm:$0xff]  ;;  %v1591_v19 = vld [vmem:[%s1926_s0 + $0x18] sm:$0xff]  ;;  %v36_v23 = vcombine.high %v20_v62, %v20_v62  ;;  %v1594_v24 = vsel %vm52_vm0, %v20_v62, 0.0  ;;  %v1599_v0 = vld [vmem:[%s1926_s0 + $0x20] sm:$0xff]  ;;  %v37_v62 = vcombine.high %v1581_v3, %v1581_v3 }
  0x2d   :  { %v1586_v18 = vld [vmem:[%s1926_s0 + $0x10] sm:$0xff]  ;;  %v1604_v63 = vld [vmem:[%s1926_s0 + $0x28] sm:$0xff]  ;;  %v39_v58 = vcombine.high %v1591_v19, %v1591_v19  ;;  %v1621_v56 = vld [vmem:[%s1926_s0 + $0x38] sm:$0xff]  ;;  %v40_v52 = vcombine.high %v1599_v0, %v1599_v0 }
  0x2e   :  { %848 = vmatpush1.bf16.msra.mxu0 %v847_v25  ;;  %v1609_v59 = vld [vmem:[%s1926_s0 + $0x30] sm:$0xff]  ;;  %v38_v25 = vcombine.high %v1586_v18, %v1586_v18  ;;  %1934 = vst [vmem:[#allocation3_spill] sm:$0xff] %v1621_v56  ;;  %v41_v51 = vcombine.high %v1604_v63, %v1604_v63  ;;  %v60_v46 = vsel %vm52_vm0, %v36_v23, 0.0  ;;  %v74_v57 = vsel %vm52_vm0, %v37_v62, 0.0 }
  0x2f   :  { %1933 = vst [vmem:[#allocation2_spill] sm:$0xff] %v1609_v59  ;;  %912 = vmatpush1.bf16.msra.mxu1 %v911_v29  ;;  %850 = vmatprep.subr.bf16.mxu0 %v849_v30  ;;  %v42_v50 = vcombine.high %v1609_v59, %v1609_v59  ;;  %v43_v29 = vcombine.high %v1621_v56, %v1621_v56  ;;  %v61_v30 = vrot.slane %v60_v46, 4  ;;  %v75_v44 = vrot.slane %v74_v57, 4 }
  0x30   :  { %914 = vmatprep.subr.bf16.mxu1 %v913_v31  ;;  %v88_v45 = vsel %vm52_vm0, %v38_v25, 0.0  ;;  %v102_v39 = vsel %vm52_vm0, %v39_v58, 0.0  ;;  %v116_v38 = vsel %vm52_vm0, %v40_v52, 0.0  ;;  %v130_v36 = vsel %vm52_vm0, %v41_v51, 0.0 }
  0x31   :  { %v89_v43 = vrot.slane %v88_v45, 4  ;;  %v62_v23 = vadd.f32 %v61_v30, %v60_v46  ;;  %v103_v31 = vrot.slane %v102_v39, 4  ;;  %v117_v37 = vrot.slane %v116_v38, 4 }
  0x32   :  { %852 = vmatpush1.bf16.msra.mxu0 %v851_v32  ;;  %v1935_v62 = vpack.c.bf16 %v1361_v5, %v1356_v4  ;;  %v1936_v25 = vpack.c.bf16 %v1371_v7, %v1366_v6  ;;  %v76_v58 = vadd.f32 %v75_v44, %v74_v57  ;;  %v131_v52 = vrot.slane %v130_v36, 4 }
  0x33   :  { %v90_v56 = vadd.f32 %v89_v43, %v88_v45  ;;  %v144_v59 = vsel %vm52_vm0, %v42_v50, 0.0  ;;  %v63_v2 = vrot.slane %v62_v23, 2  ;;  %v104_v32 = vadd.f32 %v103_v31, %v102_v39 }
  0x34   :  { %916 = vmatpush1.bf16.msra.mxu1 %v1935_v62  ;;  %854 = vmatprep.subr.bf16.mxu0 %v1936_v25  ;;  %v118_v46 = vadd.f32 %v117_v37, %v116_v38  ;;  %v145_v51 = vrot.slane %v144_v59, 4  ;;  %v77_v4 = vrot.slane %v76_v58, 2  ;;  %v132_v30 = vadd.f32 %v131_v52, %v130_v36 }
  0x35   :  { %918 = vmatprep.subr.bf16.mxu1 %v1937_v1  ;;  %v91_v5 = vrot.slane %v90_v56, 2  ;;  %v158_v6 = vsel %vm52_vm0, %v43_v29, 0.0  ;;  %v1938_v7 = vpack.c.bf16 %v1391_v11, %v1386_v10  ;;  %v64_v43 = vadd.f32 %v63_v2, %v62_v23 }
  0x36   :  { %v105_v44 = vrot.slane %v104_v32, 2  ;;  %v119_v45 = vrot.slane %v118_v46, 2  ;;  %v146_v8 = vadd.f32 %v145_v51, %v144_v59  ;;  %v1940_v37 = vpack.c.bf16 %v1411_v15, %v1406_v14 }
  0x37   :  { %856 = vmatpush1.bf16.msra.mxu0 %v1938_v7  ;;  %v78_v36 = vadd.f32 %v77_v4, %v76_v58  ;;  %v92_v38 = vadd.f32 %v91_v5, %v90_v56  ;;  %v133_v39 = vrot.slane %v132_v30, 2  ;;  %v159_v50 = vrot.slane %v158_v6, 4 }
  0x38   :  { %920 = vmatpush1.bf16.msra.mxu1 %v1939_v9  ;;  %858 = vmatprep.subr.bf16.mxu0 %v1940_v37  ;;  %v1941_v10 = vpack.c.bf16 %v1421_v17, %v1416_v16  ;;  %v65_v11 = vrot.slane %v64_v43, 1  ;;  %v106_v57 = vadd.f32 %v105_v44, %v104_v32  ;;  %v120_v59 = vadd.f32 %v119_v45, %v118_v46 }
  0x39   :  { %v147_v29 = vrot.slane %v146_v8, 2  ;;  %v79_v12 = vrot.slane %v78_v36, 1  ;;  %v93_v13 = vrot.slane %v92_v38, 1  ;;  %v134_v23 = vadd.f32 %v133_v39, %v132_v30 }
  0x3a   :  { %922 = vmatprep.subr.bf16.mxu1 %v1941_v10  ;;  %v160_v31 = vadd.f32 %v159_v50, %v158_v6  ;;  %v1942_v14 = vpack.c.bf16 %v1435_v21, %v1430_v20  ;;  %v66_v15 = vadd.f32 %v65_v11, %v64_v43  ;;  %v107_v56 = vrot.slane %v106_v57, 1 }
  0x3b   :  { %v121_v62 = vrot.slane %v120_v59, 1  ;;  %v148_v25 = vadd.f32 %v147_v29, %v146_v8  ;;  %v1943_v16 = vpack.c.bf16 %v1451_v26, %v1440_v22  ;;  %v1944_v17 = vpack.c.bf16 %v1461_v28, %v1456_v27 }
  0x3c   :  { %860 = vmatpush1.bf16.msra.mxu0 %v1942_v14  ;;  %v80_v58 = vadd.f32 %v79_v12, %v78_v36  ;;  %v94_v52 = vadd.f32 %v93_v13, %v92_v38  ;;  %v135_v1 = vrot.slane %v134_v23, 1  ;;  %v161_v2 = vrot.slane %v160_v31, 2 }
  0x3d   :  { %924 = vmatpush1.bf16.msra.mxu1 %v1943_v16  ;;  %862 = vmatprep.subr.bf16.mxu0 %v1944_v17  ;;  %v1945_v20 = vpack.c.bf16 %v1479_v34, %v1474_v33  ;;  %v108_v21 = vadd.f32 %v107_v56, %v106_v57  ;;  %v122_v32 = vadd.f32 %v121_v62, %v120_v59  ;;  %v149_v46 = vrot.slane %v148_v25, 1  ;;  %v1953_v56 = vld [vmem:[#allocation2_spill] sm:$0xff] }
  0x3e   :  { %v167_v51 = vmul.f32 0.25, %v66_v15  ;;  %v136_v4 = vadd.f32 %v135_v1, %v134_v23  ;;  %v162_v5 = vadd.f32 %v161_v2, %v160_v31  ;;  %v169_v22 = vmul.f32 0.25, %v80_v58  ;;  %v534_v2 = vld [vmem:[%s1927_s3 + $0x88] sm:$0xff] }
  0x3f   :  { %926 = vmatprep.subr.bf16.mxu1 %v1945_v20  ;;  %v171_v26 = vmul.f32 0.25, %v94_v52  ;;  %v1946_v27 = vpack.c.bf16 %v1497_v40, %v1484_v35  ;;  %v150_v28 = vadd.f32 %v149_v46, %v148_v25  ;;  %v173_v30 = vmul.f32 0.25, %v108_v21  ;;  %v1954_v25 = vld [vmem:[#allocation3_spill] sm:$0xff] }
  0x40   :  { %v175_v6 = vmul.f32 0.25, %v122_v32  ;;  %v1947_v7 = vrot.slane %v1594_v24, 4  ;;  %v1948_v34 = vpack.c.bf16 %v1507_v42, %v1502_v41  ;;  %v1949_v43 = vpack.c.bf16 %v1525_v48, %v1520_v47 }
  0x41   :  { %864 = vmatpush1.bf16.msra.mxu0 %v1946_v27  ;;  %v163_v44 = vrot.slane %v162_v5, 1  ;;  %v177_v45 = vmul.f32 0.25, %v136_v4  ;;  %v362_v35 = vsel %vm348_vm1, %v169_v22, %v167_v51  ;;  %v67_v40 = vsel %vm52_vm0, %v1581_v3, 0.0  ;;  %v566_v27 = vld [vmem:[%s1927_s3 + $0x188] sm:$0xff] }
  0x42   :  { %v55_v33 = vadd.f32 %v1947_v7, %v1594_v24  ;;  %928 = vmatpush1.bf16.msra.mxu1 %v1948_v34  ;;  %866 = vmatprep.subr.bf16.mxu0 %v1949_v43  ;;  %v1950_v8 = vpack.c.bf16 %v1541_v53, %v1530_v49  ;;  %v179_v24 = vmul.f32 0.25, %v150_v28  ;;  %v363_v9 = vsel %vm350_vm2, %v171_v26, %v362_v35  ;;  %v565_v26 = vld [vmem:[%s1927_s3 + $0x180] sm:$0xff] }
  0x43   :  { %v68_v42 = vrot.slane %v67_v40, 4  ;;  %v164_v37 = vadd.f32 %v163_v44, %v162_v5  ;;  %v364_v47 = vsel %vm352_vm3, %v173_v30, %v363_v9  ;;  %v81_v48 = vsel %vm52_vm0, %v1586_v18, 0.0 }
  0x44   :  { %930 = vmatprep.subr.bf16.mxu1 %v1950_v8  ;;  %v56_v41 = vrot.slane %v55_v33, 2  ;;  %v95_v36 = vsel %vm52_vm0, %v1591_v19, 0.0  ;;  %v1951_v3 = vpack.c.bf16 %v1551_v55, %v1546_v54  ;;  %v365_v49 = vsel %vm354_vm4, %v175_v6, %v364_v47 }
  0x45   :  { %v69_v38 = vadd.f32 %v68_v42, %v67_v40  ;;  %v82_v39 = vrot.slane %v81_v48, 4  ;;  %v1952_v50 = vpack.c.bf16 %v1569_v61, %v1564_v60  ;;  %v181_v10 = vmul.f32 0.25, %v164_v37 }
  0x46   :  { %868 = vmatpush1.bf16.msra.mxu0 %v1951_v3  ;;  %v57_v53 = vadd.f32 %v56_v41, %v55_v33  ;;  %v366_v11 = vsel %vm356_vm5, %v177_v45, %v365_v49  ;;  %v96_v18 = vrot.slane %v95_v36, 4  ;;  %v109_v19 = vsel %vm52_vm0, %v1599_v0, 0.0 }
  0x47   :  { %932 = vmatpush1.bf16.msra.mxu1 %v1952_v50  ;;  %v367_v57 = vsel %vm358_vm6, %v179_v24, %v366_v11  ;;  %v70_v55 = vrot.slane %v69_v38, 2  ;;  %v83_v59 = vadd.f32 %v82_v39, %v81_v48  ;;  %v110_v13 = vrot.slane %v109_v19, 4  ;;  %v517_v50 = vld [vmem:[%s1927_s3] sm:$0xff] }
  0x48   :  { %v58_v54 = vrot.slane %v57_v53, 1  ;;  %v368_v29 = vsel %vm360_vm7, %v181_v10, %v367_v57  ;;  %v97_v12 = vadd.f32 %v96_v18, %v95_v36  ;;  %v123_v60 = vsel %vm52_vm0, %v1604_v63, 0.0  ;;  %v533_v63 = vld [vmem:[%s1927_s3 + $0x80] sm:$0xff]  ;;  %v518_v10 = vld [vmem:[%s1927_s3 + $0x8] sm:$0xff] }
  0x49   :  { %435 = vmatprep.mubr.f32.mxu0 %v368_v29  ;;  %506 = vmatprep.mubr.f32.mxu1 %v368_v29  ;;  %v71_v23 = vadd.f32 %v70_v55, %v69_v38  ;;  %v84_v31 = vrot.slane %v83_v59, 2  ;;  %v124_v14 = vrot.slane %v123_v60, 4  ;;  %v111_v0 = vadd.f32 %v110_v13, %v109_v19  ;;  %v549_v19 = vld [vmem:[%s1927_s3 + $0x100] sm:$0xff]  ;;  %v550_v57 = vld [vmem:[%s1927_s3 + $0x108] sm:$0xff]  ;;  %v536_v29 = vld [vmem:[%s1927_s3 + $0x98] sm:$0xff] }
  0x4a   :  { %v59_v61 = vadd.f32 %v58_v54, %v57_v53  ;;  %v98_v15 = vrot.slane %v97_v12, 2  ;;  %v137_v62 = vsel %vm52_vm0, %v1953_v56, 0.0  ;;  %v151_v16 = vsel %vm52_vm0, %v1954_v25, 0.0  ;;  %v535_v54 = vld [vmem:[%s1927_s3 + $0x90] sm:$0xff]  ;;  %v568_v13 = vld [vmem:[%s1927_s3 + $0x198] sm:$0xff] }
  0x4b   :  { %v72_v17 = vrot.slane %v71_v23, 1  ;;  %v85_v58 = vadd.f32 %v84_v31, %v83_v59  ;;  %v125_v52 = vadd.f32 %v124_v14, %v123_v60  ;;  %v138_v1 = vrot.slane %v137_v62, 4 }
  0x4c   :  { %v99_v20 = vadd.f32 %v98_v15, %v97_v12  ;;  %v112_v21 = vrot.slane %v111_v0, 2  ;;  %v152_v32 = vrot.slane %v151_v16, 4  ;;  %v166_v46 = vmul.f32 0.25, %v59_v61  ;;  %v567_v12 = vld [vmem:[%s1927_s3 + $0x190] sm:$0xff] }
  0x4d   :  { %v73_v51 = vadd.f32 %v72_v17, %v71_v23  ;;  %v86_v4 = vrot.slane %v85_v58, 1  ;;  %v126_v5 = vrot.slane %v125_v52, 2  ;;  %v139_v22 = vadd.f32 %v138_v1, %v137_v62  ;;  %v519_v15 = vld [vmem:[%s1927_s3 + $0x10] sm:$0xff]  ;;  %v552_v17 = vld [vmem:[%s1927_s3 + $0x118] sm:$0xff]  ;;  %v538_v1 = vld [vmem:[%s1927_s3 + $0xa8] sm:$0xff] }
  0x4e   :  { %v100_v28 = vrot.slane %v99_v20, 1  ;;  %v113_v30 = vadd.f32 %v112_v21, %v111_v0  ;;  %v153_v6 = vadd.f32 %v152_v32, %v151_v16  ;;  %v933_v7 = vpack.c.bf16 %v534_v2, %v533_v63  ;;  %v520_v0 = vld [vmem:[%s1927_s3 + $0x18] sm:$0xff]  ;;  %v551_v16 = vld [vmem:[%s1927_s3 + $0x110] sm:$0xff]  ;;  %v569_v63 = vld [vmem:[%s1927_s3 + $0x1a0] sm:$0xff] }
  0x4f   :  { %v87_v33 = vadd.f32 %v86_v4, %v85_v58  ;;  %v127_v34 = vadd.f32 %v126_v5, %v125_v52  ;;  %v140_v43 = vrot.slane %v139_v22, 2  ;;  %v168_v44 = vmul.f32 0.25, %v73_v51  ;;  %v537_v58 = vld [vmem:[%s1927_s3 + $0xa0] sm:$0xff]  ;;  %v570_v2 = vld [vmem:[%s1927_s3 + $0x1a8] sm:$0xff] }
  0x50   :  { %v101_v45 = vadd.f32 %v100_v28, %v99_v20  ;;  %v114_v35 = vrot.slane %v113_v30, 1  ;;  %v154_v40 = vrot.slane %v153_v6, 2  ;;  %934 = vmatprep.subr.bf16.mxu0 %v933_v7  ;;  %v965_v8 = vpack.c.bf16 %v566_v27, %v565_v26  ;;  %v521_v32 = vld [vmem:[%s1927_s3 + $0x20] sm:$0xff]  ;;  %v539_v26 = vld [vmem:[%s1927_s3 + $0xb0] sm:$0xff]  ;;  %v540_v27 = vld [vmem:[%s1927_s3 + $0xb8] sm:$0xff] }
  0x51   :  { %v128_v24 = vrot.slane %v127_v34, 1  ;;  %v141_v9 = vadd.f32 %v140_v43, %v139_v22  ;;  %v170_v41 = vmul.f32 0.25, %v87_v33  ;;  %v349_v42 = vsel %vm348_vm1, %v168_v44, %v166_v46  ;;  %v522_v46 = vld [vmem:[%s1927_s3 + $0x28] sm:$0xff]  ;;  %v553_v5 = vld [vmem:[%s1927_s3 + $0x120] sm:$0xff]  ;;  %v571_v28 = vld [vmem:[%s1927_s3 + $0x1b0] sm:$0xff] }
  0x52   :  { %v115_v37 = vadd.f32 %v114_v35, %v113_v30  ;;  %v155_v47 = vadd.f32 %v154_v40, %v153_v6  ;;  %v172_v48 = vmul.f32 0.25, %v101_v45  ;;  %966 = vmatprep.subr.bf16.mxu1 %v965_v8  ;;  %v935_v31 = vpack.c.bf16 %v518_v10, %v517_v50  ;;  %v554_v22 = vld [vmem:[%s1927_s3 + $0x128] sm:$0xff]  ;;  %v572_v30 = vld [vmem:[%s1927_s3 + $0x1b8] sm:$0xff]  ;;  %v523_v33 = vld [vmem:[%s1927_s3 + $0x30] sm:$0xff] }
  0x53   :  { %v129_v36 = vadd.f32 %v128_v24, %v127_v34  ;;  %v142_v3 = vrot.slane %v141_v9, 1  ;;  %v351_v49 = vsel %vm350_vm2, %v170_v41, %v349_v42  ;;  %v967_v14 = vpack.c.bf16 %v550_v57, %v549_v19  ;;  %v524_v34 = vld [vmem:[%s1927_s3 + $0x38] sm:$0xff]  ;;  %v555_v45 = vld [vmem:[%s1927_s3 + $0x130] sm:$0xff]  ;;  %v541_v40 = vld [vmem:[%s1927_s3 + $0xc0] sm:$0xff] }
  0x54   :  { %v156_v53 = vrot.slane %v155_v47, 1  ;;  %v174_v38 = vmul.f32 0.25, %v115_v37  ;;  %v353_v39 = vsel %vm352_vm3, %v172_v48, %v351_v49  ;;  %v937_v62 = vpack.c.bf16 %v536_v29, %v535_v54  ;;  %v556_v35 = vld [vmem:[%s1927_s3 + $0x138] sm:$0xff]  ;;  %v542_v8 = vld [vmem:[%s1927_s3 + $0xc8] sm:$0xff]  ;;  %v573_v24 = vld [vmem:[%s1927_s3 + $0x1c0] sm:$0xff] }
  0x55   :  { %v143_v11 = vadd.f32 %v142_v3, %v141_v9  ;;  %v176_v18 = vmul.f32 0.25, %v129_v36  ;;  %v969_v25 = vpack.c.bf16 %v568_v13, %v567_v12  ;;  %v939_v20 = vpack.c.bf16 %v520_v0, %v519_v15  ;;  %v574_v9 = vld [vmem:[%s1927_s3 + $0x1c8] sm:$0xff]  ;;  %v525_v37 = vld [vmem:[%s1927_s3 + $0x40] sm:$0xff]  ;;  %v576_v50 = vld [vmem:[%s1927_s3 + $0x1d8] sm:$0xff] }
  0x56   :  { %v157_v55 = vadd.f32 %v156_v53, %v155_v47  ;;  %v355_v59 = vsel %vm354_vm4, %v174_v38, %v353_v39  ;;  %v971_v21 = vpack.c.bf16 %v552_v17, %v551_v16  ;;  %v941_v51 = vpack.c.bf16 %v538_v1, %v537_v58  ;;  %v526_v47 = vld [vmem:[%s1927_s3 + $0x48] sm:$0xff]  ;;  %v557_v3 = vld [vmem:[%s1927_s3 + $0x140] sm:$0xff]  ;;  %v543_v53 = vld [vmem:[%s1927_s3 + $0xd0] sm:$0xff] }
  0x57   :  { %v178_v60 = vmul.f32 0.25, %v143_v11  ;;  %v357_v61 = vsel %vm356_vm5, %v176_v18, %v355_v59  ;;  %v973_v4 = vpack.c.bf16 %v570_v2, %v569_v63  ;;  %v943_v6 = vpack.c.bf16 %v522_v46, %v521_v32  ;;  %v558_v49 = vld [vmem:[%s1927_s3 + $0x148] sm:$0xff]  ;;  %v544_v38 = vld [vmem:[%s1927_s3 + $0xd8] sm:$0xff]  ;;  %v575_v39 = vld [vmem:[%s1927_s3 + $0x1d0] sm:$0xff] }
  0x58   :  { %v180_v23 = vmul.f32 0.25, %v157_v55  ;;  %v975_v7 = vpack.c.bf16 %v554_v22, %v553_v5  ;;  %v945_v43 = vpack.c.bf16 %v540_v27, %v539_v26  ;;  %v977_v44 = vpack.c.bf16 %v572_v30, %v571_v28  ;;  %v527_v18 = vld [vmem:[%s1927_s3 + $0x50] sm:$0xff]  ;;  %v528_v19 = vld [vmem:[%s1927_s3 + $0x58] sm:$0xff]  ;;  %v545_v29 = vld [vmem:[%s1927_s3 + $0xe0] sm:$0xff] }
  0x59   :  { %v359_v56 = vsel %vm358_vm6, %v178_v60, %v357_v61  ;;  %v947_v41 = vpack.c.bf16 %v524_v34, %v523_v33  ;;  %v979_v42 = vpack.c.bf16 %v556_v35, %v555_v45  ;;  %v949_v48 = vpack.c.bf16 %v542_v8, %v541_v40  ;;  %v559_v55 = vld [vmem:[%s1927_s3 + $0x150] sm:$0xff]  ;;  %v560_v59 = vld [vmem:[%s1927_s3 + $0x158] sm:$0xff]  ;;  %v546_v12 = vld [vmem:[%s1927_s3 + $0xe8] sm:$0xff] }
  0x5a   :  { %v361_v52 = vsel %vm360_vm7, %v180_v23, %v359_v56  ;;  %v981_v36 = vpack.c.bf16 %v574_v9, %v573_v24  ;;  %v951_v10 = vpack.c.bf16 %v526_v47, %v525_v37  ;;  %v983_v11 = vpack.c.bf16 %v558_v49, %v557_v3  ;;  %v577_v13 = vld [vmem:[%s1927_s3 + $0x1e0] sm:$0xff]  ;;  %v578_v60 = vld [vmem:[%s1927_s3 + $0x1e8] sm:$0xff]  ;;  %v547_v17 = vld [vmem:[%s1927_s3 + $0xf0] sm:$0xff] }
  0x5b   :  { %436 = vmatmul.mubr.f32.vlgmr.msra.gmra.mrb[0].mxu0 %v361_v52  ;;  %507 = vmatmul.mubr.f32.vlgmr.msra.gmra.mrb[0].mxu1 %v361_v52  ;;  %v953_v57 = vpack.c.bf16 %v544_v38, %v543_v53  ;;  %v985_v54 = vpack.c.bf16 %v576_v50, %v575_v39  ;;  %v955_v61 = vpack.c.bf16 %v528_v19, %v527_v18  ;;  %v529_v15 = vld [vmem:[%s1927_s3 + $0x60] sm:$0xff]  ;;  %v530_v0 = vld [vmem:[%s1927_s3 + $0x68] sm:$0xff]  ;;  %v548_v58 = vld [vmem:[%s1927_s3 + $0xf8] sm:$0xff]  ;;  %v312_v5 = vlaneseq }
  0x5c   :  { %936 = vmatpush3.bf16.msra.mxu0 %v935_v31  ;;  %968 = vmatpush3.bf16.msra.mxu1 %v967_v14  ;;  %v987_v23 = vpack.c.bf16 %v560_v59, %v559_v55  ;;  %v957_v31 = vpack.c.bf16 %v546_v12, %v545_v29  ;;  %v989_v14 = vpack.c.bf16 %v578_v60, %v577_v13  ;;  %v561_v56 = vld [vmem:[%s1927_s3 + $0x160] sm:$0xff]  ;;  %v579_v52 = vld [vmem:[%s1927_s3 + $0x1f0] sm:$0xff]  ;;  %v580_v63 = vld [vmem:[%s1927_s3 + $0x1f8] sm:$0xff] }
  0x5d   :  { %938 = vmatprep.subr.bf16.mxu0 %v937_v62  ;;  %970 = vmatprep.subr.bf16.mxu1 %v969_v25  ;;  %v959_v62 = vpack.c.bf16 %v530_v0, %v529_v15  ;;  %v562_v25 = vld [vmem:[%s1927_s3 + $0x168] sm:$0xff]  ;;  %v961_v1 = vpack.c.bf16 %v548_v58, %v547_v17  ;;  %v531_v2 = vld [vmem:[%s1927_s3 + $0x70] sm:$0xff]  ;;  %v313_v22 = vshrl.u32 %v312_v5, 7  ;;  %v310_v28 = vld [vmem:[%s1928_s2] sm:$0xf] }
  0x5e   :  { %v991_v16 = vpack.c.bf16 %v562_v25, %v561_v56  ;;  %v563_v46 = vld [vmem:[%s1927_s3 + $0x170] sm:$0xff]  ;;  %v734_v49 = vld [vmem:[%s1929_s4] ss:$0 sm:$0xff] }
  0x5f   :  { %v314_v26 = vsub.s32 0, %v313_v22  ;;  %v322_v27 = vsub.s32 2, %v313_v22  ;;  %v318_v30 = vsub.s32 1, %v313_v22 }
  0x60   :  { %940 = vmatpush3.bf16.msra.mxu0 %v939_v20  ;;  %972 = vmatpush3.bf16.msra.mxu1 %v971_v21  ;;  %v532_v20 = vld [vmem:[%s1927_s3 + $0x78] sm:$0xff]  ;;  %v993_v21 = vpack.c.bf16 %v580_v63, %v579_v52 }
  0x61   :  { %942 = vmatprep.subr.bf16.mxu0 %v941_v51  ;;  %974 = vmatprep.subr.bf16.mxu1 %v973_v4  ;;  %v963_v32 = vpack.c.bf16 %v532_v20, %v531_v2  ;;  %v564_v51 = vld [vmem:[%s1927_s3 + $0x178] sm:$0xff]  ;;  %v323_v33 = vrot.slane %v310_v28, %v322_v27  ;;  %v319_v34 = vrot.slane %v310_v28, %v318_v30 }
  0x62   :  { %v995_v4 = vpack.c.bf16 %v564_v51, %v563_v46 }
  0x64   :  { %944 = vmatpush3.bf16.msra.mxu0 %v943_v6  ;;  %976 = vmatpush3.bf16.msra.mxu1 %v975_v7  ;;  %v326_v6 = vsub.s32 3, %v313_v22  ;;  %v315_v7 = vrot.slane %v310_v28, %v314_v26 }
  0x65   :  { %946 = vmatprep.subr.bf16.mxu0 %v945_v43  ;;  %978 = vmatprep.subr.bf16.mxu1 %v977_v44 }
  0x66   :  { %v327_v43 = vrot.slane %v310_v28, %v326_v6 }
  0x68   :  { %948 = vmatpush3.bf16.msra.mxu0 %v947_v41  ;;  %980 = vmatpush3.bf16.msra.mxu1 %v979_v42 }
  0x69   :  { %950 = vmatprep.subr.bf16.mxu0 %v949_v48  ;;  %982 = vmatprep.subr.bf16.mxu1 %v981_v36 }
  0x6c   :  { %952 = vmatpush3.bf16.msra.mxu0 %v951_v10  ;;  %984 = vmatpush3.bf16.msra.mxu1 %v983_v11 }
  0x6d   :  { %954 = vmatprep.subr.bf16.mxu0 %v953_v57  ;;  %986 = vmatprep.subr.bf16.mxu1 %v985_v54 }
  0x70   :  { %956 = vmatpush3.bf16.msra.mxu0 %v955_v61  ;;  %988 = vmatpush3.bf16.msra.mxu1 %v987_v23 }
  0x71   :  { %958 = vmatprep.subr.bf16.mxu0 %v957_v31  ;;  %990 = vmatprep.subr.bf16.mxu1 %v989_v14 }
  0x74   :  { %960 = vmatpush3.bf16.msra.mxu0 %v959_v62  ;;  %992 = vmatpush3.bf16.msra.mxu1 %v991_v16 }
  0x75   :  { %962 = vmatprep.subr.bf16.mxu0 %v961_v1  ;;  %994 = vmatprep.subr.bf16.mxu1 %v993_v21 }
  0x78   :  { %964 = vmatpush3.bf16.msra.mxu0 %v963_v32  ;;  %996 = vmatpush3.bf16.msra.mxu1 %v995_v4 }
 0x12e   :  { %v437_v44 = vpop.f32.mrb[0].mxu0  ;;  %v508_v45 = vpop.f32.mrb[0].mxu1 }
 0x12f   :  { %v438_v35 = vadd.f32 %v437_v44, %v315_v7  ;;  %v509_v40 = vadd.f32 %v508_v45, %v323_v33  ;;  %v439_v8 = vpop.f32.mrb[1].mxu0  ;;  %v510_v24 = vpop.f32.mrb[1].mxu1 }
 0x130   :  { %v440_v9 = vadd.f32 %v439_v8, %v319_v34  ;;  %v511_v41 = vadd.f32 %v510_v24, %v327_v43 }
 0x131   :  { %v515_v42 = vmax.f32 %v509_v40, 0.0  ;;  %v513_v48 = vmax.f32 %v438_v35, 0.0 }
 0x132   :  { %v514_v37 = vmax.f32 %v440_v9, 0.0  ;;  %v516_v47 = vmax.f32 %v511_v41, 0.0 }
 0x134   :  { %652 = vmatprep.mubr.f32.mxu0 %v514_v37  ;;  %722 = vmatprep.mubr.f32.mxu1 %v516_v47 }
 0x135   :  { %653 = vmatmul.mubr.f32.vlgmr.msra.gmra.mrb[2].mxu0 %v513_v48  ;;  %723 = vmatmul.mubr.f32.vlgmr.msra.gmra.mrb[2].mxu1 %v515_v42 }
 0x208   :  { %v767_v36 = vpop.f32.mrb[2].mxu0  ;;  %v802_v3 = vpop.f32.mrb[2].mxu1 }
 0x209   :  { %v768_v53 = vpop.f32.mrb[3].mxu0  ;;  %v803_v38 = vpop.f32.mrb[3].mxu1 }
 0x20a   :  { %v769_v39 = vadd.f32 %v768_v53, %v767_v36  ;;  %v804_v50 = vadd.f32 %v803_v38, %v802_v3 }
 0x20c   :  { %v655_v10 = vadd.f32 %v769_v39, %v734_v49 }
 0x20e   :  { %v725_v11 = vadd.f32 %v804_v50, %v655_v10 }
 0x210   :  { %729 = vst.msk [vmem:[%s1930_s5] sm:$0xff] %vm728_vm8, %v725_v11 }

</bundles_post_ra>
